<compile_context>
chip_gen: v5e
topology: v5e:2x2
jax: 0.10.0
libtpu: 0.0.40
codegen_flags: <defaults>
</compile_context>

<pallas_src>
import functools
import math

import jax
import jax.numpy as jnp
import numpy as np
from jax import lax
from jax.experimental import pallas as pl
from jax.experimental.pallas import tpu as pltpu


# ----- the (deliberately polynomial) activations from the reference module ---
def _silu_poly(x):
    return 0.125 * x * x + 0.5 * x + 0.125


def _softplus_poly(x):
    return 0.0625 * x * x + 0.5 * x + 1.0


_PAD = 8   # staging rows in front of the conv buffer (>= d_conv - 1), sublane aligned
_TB = 8    # timesteps per scan block (aligned (8, *) loads/stores)


# --------------------------- Pallas kernel -----------------------------------
def residual_mamba_kernel(
    x_ref,       # (1, Lc, d_model)      f32
    w_in_ref,    # (d_model, 2*d_inner)  compute_dtype   [x | z]
    conv_w_ref,  # (d_conv, d_inner)     f32
    conv_b_ref,  # (1, d_inner)          f32
    w_xp_ref,    # (d_inner, Npad)       compute_dtype   [delta_pre | B | C | 0-pad]
    dt_b_ref,    # (1, d_inner)          f32
    A_ref,       # (d_state, d_inner)    f32  (= -exp(A_log).T)
    D_ref,       # (1, d_inner)          f32
    w_out_ref,   # (d_inner, d_model)    compute_dtype
    out_ref,     # (1, Lc, d_model)      f32
    xext_sc,     # (Lc+_PAD, d_inner)    f32  conv staging + carried tail
    h_sc,        # (d_state, d_inner)    f32  carried SSM state (lane-dense)
    delta_sc,    # (Lc, d_inner)         f32
    dx_sc,       # (Lc, d_inner)         f32  delta * conv_out
    b_sc,        # (Lc, d_state)         f32
    c_sc,        # (Lc, d_state)         f32
    y_sc,        # (Lc, d_inner)         f32  scan output
    dA_sc,       # (_TB, d_state, Cb)    f32  per-block exp staging
    dbx_sc,      # (_TB, d_state, Cb)    f32  per-block B (x) dx staging
    hst_sc,      # (_TB, d_state, Cb)    f32  per-block h history
    *,
    Lc, d_conv, d_inner, d_state, Cb, compute_dtype,
):
    c = pl.program_id(1)
    cdt = compute_dtype

    # ---- reset carried state at the start of each sequence ------------------
    @pl.when(c == 0)
    def _():
        h_sc[...] = jnp.zeros_like(h_sc)
        xext_sc[pl.ds(0, _PAD), :] = jnp.zeros((_PAD, d_inner), jnp.float32)

    x = x_ref[0]                                             # (Lc, d_model)

    # ---- fused in_proj: [x | z] (weights pre-cast to compute_dtype) ---------
    xz = jnp.dot(x.astype(cdt), w_in_ref[...],
                 preferred_element_type=jnp.float32)         # (Lc, 2*d_inner)
    xc = xz[:, :d_inner]
    z = xz[:, d_inner:]

    # ---- causal depthwise conv1d (groups=d_inner, left pad d_conv-1) --------
    conv_w = conv_w_ref[...]                                 # (d_conv, d_inner)
    xext_sc[pl.ds(_PAD, Lc), :] = xc
    xe = xext_sc[...]                                        # single VMEM read
    acc = conv_b_ref[...] + jnp.zeros((Lc, d_inner), jnp.float32)
    for k in range(d_conv):
        off = _PAD - (d_conv - 1) + k
        acc = acc + conv_w[k:k + 1, :] * xe[off:off + Lc, :]
    if d_conv > 1:
        # carry the last d_conv-1 pre-activation rows into the next chunk
        xext_sc[pl.ds(_PAD - (d_conv - 1), d_conv - 1), :] = xc[Lc - (d_conv - 1):, :]
    xs = _silu_poly(acc)                                     # (Lc, d_inner)

    # ---- fused x_proj + dt_proj: [delta_pre | B | C | pad]; softplus --------
    dbc = jnp.dot(xs.astype(cdt), w_xp_ref[...],
                  preferred_element_type=jnp.float32)        # (Lc, Npad)
    delta = _softplus_poly(dbc[:, :d_inner] + dt_b_ref[...])
    delta_sc[...] = delta                                    # (Lc, d_inner)
    dx_sc[...] = delta * xs                                  # (Lc, d_inner)
    b_sc[...] = dbc[:, d_inner:d_inner + d_state]            # (Lc, d_state)
    c_sc[...] = dbc[:, d_inner + d_state:d_inner + 2 * d_state]

    # ---- selective scan: h_t = exp(delta_t*A) h_{t-1} + delta_t B_t x_t -----
    # Blocked 8 timesteps x Cb channels; channel blocks are independent.
    n_blk = Lc // _TB
    for c0 in range(0, d_inner, Cb):
        cds = pl.ds(c0, Cb)

        def block_body(blk, h, cds=cds):
            t0 = pl.multiple_of(blk * _TB, _TB)
            tds = pl.ds(t0, _TB)
            delta_blk = delta_sc[tds, cds]                   # (TB, Cb)
            dx_blk = dx_sc[tds, cds]                         # (TB, Cb)
            B_blk = b_sc[tds, :]                             # (TB, d_state)
            C_blk = c_sc[tds, :]                             # (TB, d_state)
            a_blk = A_ref[:, cds]                            # (d_state, Cb)
            # off-critical-path vectorized staging (EUP exp + lane broadcasts)
            dA_sc[...] = jnp.exp(delta_blk[:, None, :] * a_blk[None, :, :])
            dbx_sc[...] = B_blk[:, :, None] * dx_blk[:, None, :]
            # serial recurrence: pure load + mul + add chain
            for t in range(_TB):
                h = dA_sc[t] * h + dbx_sc[t]
                hst_sc[t] = h
            # vectorized y for the whole block -> one aligned (TB, Cb) store
            y_sc[tds, cds] = jnp.sum(C_blk[:, :, None] * hst_sc[...], axis=1)
            return h

        h_fin = lax.fori_loop(0, n_blk, block_body, h_sc[:, cds])
        h_sc[:, cds] = h_fin                                 # carry to next chunk

    # ---- y = scan + D*x ; gate with silu(z) ; out_proj ; residual add -------
    y = y_sc[...] + D_ref[...] * xs
    out = jnp.dot((y * _silu_poly(z)).astype(cdt), w_out_ref[...],
                  preferred_element_type=jnp.float32)        # (Lc, d_model)
    out_ref[...] = (out + x)[None, :, :].astype(out_ref.dtype)   # ResidualBlock


# --------------------------- wrapper ------------------------------------------
def _round_up(x, m):
    return ((x + m - 1) // m) * m


def _pick_chunk(L, target):
    """Always bounded by target (multiple of 8); never falls back to L."""
    target = max(_TB, _round_up(target, _TB))
    return min(target, _round_up(L, _TB))


def _pick_cblock(d_inner, d_state):
    """Channel (lane) block so the fori-carried h block stays ~8 vregs."""
    target = max(128, 8192 // max(d_state, 1))
    if d_inner <= target:
        return d_inner
    for cand in range(target, 127, -128):
        if d_inner % cand == 0:
            return cand
    return d_inner


def residual_block_pallas(x, kp, *, d_conv, chunk_target=None,
                          compute_dtype=jnp.float32,
                          vmem_limit_bytes=48 * 1024 * 1024):
    B, L, d_model = x.shape
    d_inner = kp["conv_w"].shape[1]
    d_state = kp["A"].shape[0]
    dt_rank = kp["dt_w"].shape[0]

    if chunk_target is None:
        # v7x has 64 MiB VMEM: shrink chunks at production d_inner.
        # On v6e (128 MiB) chunk_target 512-1024 + vmem_limit ~96 MiB is better.
        chunk_target = 128 if d_inner >= 2048 else 256

    Lc = _pick_chunk(L, chunk_target)
    assert Lc % _TB == 0
    assert d_conv - 1 <= _PAD and d_conv - 1 <= Lc
    n_chunks = (L + Lc - 1) // Lc
    L_pad = n_chunks * Lc
    x_in = jnp.pad(x, ((0, 0), (0, L_pad - L), (0, 0))) if L_pad != L else x

    Cb = _pick_cblock(d_inner, d_state)
    assert d_inner % Cb == 0

    # ---- host-side weight prep: fold dt_proj into x_proj, pad N to 128, -----
    # ---- and pre-cast MXU weights to compute_dtype.                      -----
    w_delta = kp["w_xproj"][:, :dt_rank] @ kp["dt_w"]        # (d_inner, d_inner)
    w_xp = jnp.concatenate([w_delta, kp["w_xproj"][:, dt_rank:]], axis=1)
    n_xp = w_xp.shape[1]
    n_xp_pad = _round_up(n_xp, 128)
    if n_xp_pad != n_xp:
        w_xp = jnp.pad(w_xp, ((0, 0), (0, n_xp_pad - n_xp)))

    w_in = kp["w_in"].astype(compute_dtype)
    w_xp = w_xp.astype(compute_dtype)
    w_out = kp["w_out"].astype(compute_dtype)

    kernel = functools.partial(
        residual_mamba_kernel, Lc=Lc, d_conv=d_conv, d_inner=d_inner,
        d_state=d_state, Cb=Cb, compute_dtype=compute_dtype)

    def _full_spec(arr):
        n = arr.ndim
        return pl.BlockSpec(arr.shape, lambda b, c, _n=n: (0,) * _n)

    weights = [w_in, kp["conv_w"], kp["conv_b"], w_xp, kp["dt_b"],
               kp["A"], kp["D"], w_out]

    in_specs = [pl.BlockSpec((1, Lc, d_model), lambda b, c: (b, c, 0))]
    # Constant index_maps: Pallas elides the weight re-DMA across grid steps.
    in_specs += [_full_spec(w) for w in weights]

    grid_spec = pltpu.PrefetchScalarGridSpec(
        num_scalar_prefetch=0,
        # Chunk axis MUST stay last and "arbitrary": h_sc / conv-tail are
        # carried sequentially across chunks of the same sequence.
        grid=(B, n_chunks),
        in_specs=in_specs,
        out_specs=pl.BlockSpec((1, Lc, d_model), lambda b, c: (b, c, 0)),
        scratch_shapes=[
            pltpu.VMEM((Lc + _PAD, d_inner), jnp.float32),   # conv staging/tail
            pltpu.VMEM((d_state, d_inner), jnp.float32),     # carried h
            pltpu.VMEM((Lc, d_inner), jnp.float32),          # delta
            pltpu.VMEM((Lc, d_inner), jnp.float32),          # delta * xs
            pltpu.VMEM((Lc, d_state), jnp.float32),          # B rows
            pltpu.VMEM((Lc, d_state), jnp.float32),          # C rows
            pltpu.VMEM((Lc, d_inner), jnp.float32),          # y (scan output)
            pltpu.VMEM((_TB, d_state, Cb), jnp.float32),     # exp(delta*A) staging
            pltpu.VMEM((_TB, d_state, Cb), jnp.float32),     # B (x) dx staging
            pltpu.VMEM((_TB, d_state, Cb), jnp.float32),     # h history
        ],
    )

    out = pl.pallas_call(
        kernel,
        out_shape=jax.ShapeDtypeStruct((B, L_pad, d_model), jnp.float32),
        grid_spec=grid_spec,
        compiler_params=pltpu.CompilerParams(
            dimension_semantics=("parallel", "arbitrary"),
            vmem_limit_bytes=vmem_limit_bytes),
    )(x_in, *weights)
    return out[:, :L, :] if L_pad != L else out


# --------------------------- pure-JAX reference -------------------------------
def residual_block_ref(x, kp, *, d_conv):
    B, L, _ = x.shape
    d_inner = kp["conv_w"].shape[1]
    d_state = kp["A"].shape[0]
    dt_rank = kp["dt_w"].shape[0]
    xz = x @ kp["w_in"]
    xc, z = xz[..., :d_inner], xz[..., d_inner:]
    xp = jnp.concatenate(
        [jnp.zeros((B, d_conv - 1, d_inner), jnp.float32), xc], axis=1)
    acc = jnp.zeros_like(xc) + kp["conv_b"]
    for k in range(d_conv):
        acc = acc + kp["conv_w"][k] * xp[:, k:k + L, :]
    xs = _silu_poly(acc)
    dbc = xs @ kp["w_xproj"]
    delta_r = dbc[..., :dt_rank]
    Bm = dbc[..., dt_rank:dt_rank + d_state]
    Cm = dbc[..., dt_rank + d_state:]
    delta = _softplus_poly(delta_r @ kp["dt_w"] + kp["dt_b"])
    A = kp["A"].T                                        # (d_inner, d_state)
    dA = jnp.exp(delta[..., None] * A)
    bx = delta[..., None] * Bm[:, :, None, :] * xs[..., None]
    h = jnp.zeros((B, d_inner, d_state), jnp.float32)
    ys = []
    for t in range(L):
        h = dA[:, t] * h + bx[:, t]
        ys.append(jnp.sum(h * Cm[:, t, None, :], axis=-1))
    y = jnp.stack(ys, axis=1) + kp["D"] * xs
    return (y * _silu_poly(z)) @ kp["w_out"] + x         # residual add


# --------------------------- parameter construction ---------------------------
def make_params(key, *, d_model, d_state, d_conv, dt_rank, d_inner,
                dt_min=0.001, dt_max=0.1, dt_scale=1.0, dt_init_floor=1e-4):
    ks = jax.random.split(key, 8)
    w_in = 0.05 * jax.random.normal(ks[0], (2 * d_inner, d_model), jnp.float32)
    conv_w = 0.2 * jax.random.normal(ks[1], (d_inner, d_conv), jnp.float32)
    conv_b = 0.1 * jax.random.normal(ks[2], (d_inner,), jnp.float32)
    x_proj_w = 0.05 * jax.random.normal(
        ks[3], (dt_rank + 2 * d_state, d_inner), jnp.float32)
    dt_init_std = dt_rank ** (-0.5) * dt_scale
    dt_w = jax.random.uniform(ks[4], (d_inner, dt_rank), jnp.float32,
                              minval=-dt_init_std, maxval=dt_init_std)
    dt = jnp.exp(jax.random.uniform(ks[5], (d_inner,), jnp.float32)
                 * (math.log(dt_max) - math.log(dt_min)) + math.log(dt_min))
    dt = jnp.clip(dt, dt_init_floor, None)
    inv_dt = dt + jnp.log(-jnp.expm1(-dt))
    A_log = jnp.log(jnp.tile(jnp.arange(1, d_state + 1, dtype=jnp.float32),
                             (d_inner, 1)))
    A = -jnp.exp(A_log)                                  # (d_inner, d_state)
    D = jnp.ones((d_inner,), jnp.float32)
    out_w = 0.05 * jax.random.normal(ks[6], (d_model, d_inner), jnp.float32)

    # kernel-friendly (transposed / fused / 2-D) parameter pack
    kp = {
        "w_in": w_in.T,                                  # (d_model, 2*d_inner) [x|z]
        "conv_w": conv_w.T,                              # (d_conv, d_inner)
        "conv_b": conv_b[None, :],                       # (1, d_inner)
        "w_xproj": x_proj_w.T,                           # (d_inner, dt_rank+2*d_state)
        "dt_w": dt_w.T,                                  # (dt_rank, d_inner)
        "dt_b": inv_dt[None, :],                         # (1, d_inner)
        "A": A.T,                                        # (d_state, d_inner)
        "D": D[None, :],                                 # (1, d_inner)
        "w_out": out_w.T,                                # (d_inner, d_model)
    }
    return kp


if __name__ == "__main__":
    # small, module-consistent shapes
    d_model = 32
    expand_factor = 2
    d_inner = expand_factor * d_model        # 64
    dt_rank = math.ceil(d_model / 16)        # 2
    d_state = 16
    d_conv = 4
    B, L = 2, 8

    key = jax.random.PRNGKey(0)
    k_x, k_p, k_x2, k_x3 = jax.random.split(key, 4)
    kp = make_params(k_p, d_model=d_model, d_state=d_state, d_conv=d_conv,
                     dt_rank=dt_rank, d_inner=d_inner)

    # --- base config: f32 matmul path (tight tolerance) -----------------------
    x = jax.random.normal(k_x, (B, L, d_model), jnp.float32)
    ref = jax.block_until_ready(residual_block_ref(x, kp, d_conv=d_conv))
    out = jax.block_until_ready(residual_block_pallas(x, kp, d_conv=d_conv))
    assert out.shape == (B, L, d_model)
    assert np.all(np.isfinite(np.asarray(out)))
    np.testing.assert_allclose(np.asarray(out), np.asarray(ref),
                               rtol=2e-4, atol=2e-4)

    # --- multi-chunk path: carried SSM state + conv tail across chunks --------
    L2 = 24
    x2 = jax.random.normal(k_x2, (B, L2, d_model), jnp.float32)
    ref2 = jax.block_until_ready(residual_block_ref(x2, kp, d_conv=d_conv))
    out2 = jax.block_until_ready(
        residual_block_pallas(x2, kp, d_conv=d_conv, chunk_target=8))
    np.testing.assert_allclose(np.asarray(out2), np.asarray(ref2),
                               rtol=2e-4, atol=2e-4)

    # --- ragged length (exercises the zero-pad remainder path) ----------------
    L3 = 13
    x3 = jax.random.normal(k_x3, (B, L3, d_model), jnp.float32)
    ref3 = jax.block_until_ready(residual_block_ref(x3, kp, d_conv=d_conv))
    out3 = jax.block_until_ready(
        residual_block_pallas(x3, kp, d_conv=d_conv, chunk_target=8))
    np.testing.assert_allclose(np.asarray(out3), np.asarray(ref3),
                               rtol=2e-4, atol=2e-4)

    # --- bf16-operand MXU path (v6e/v7x); the scan recurrence stays f32 -------
    out_bf16 = jax.block_until_ready(
        residual_block_pallas(x, kp, d_conv=d_conv,
                              compute_dtype=jnp.bfloat16))
    np.testing.assert_allclose(np.asarray(out_bf16), np.asarray(ref),
                               rtol=2e-2, atol=2e-2)

    print("KERNEL_OK")
</pallas_src>

<mosaic_0001>
module attributes {stable_mosaic.version = 11 : i64} {
  func.func @residual_mamba_kernel(%arg0: i32, %arg1: i32, %arg2: memref<1x8x32xf32, #tpu.memory_space<vmem>>, %arg3: memref<32x128xf32, #tpu.memory_space<vmem>>, %arg4: memref<4x64xf32, #tpu.memory_space<vmem>>, %arg5: memref<1x64xf32, #tpu.memory_space<vmem>>, %arg6: memref<64x128xf32, #tpu.memory_space<vmem>>, %arg7: memref<1x64xf32, #tpu.memory_space<vmem>>, %arg8: memref<16x64xf32, #tpu.memory_space<vmem>>, %arg9: memref<1x64xf32, #tpu.memory_space<vmem>>, %arg10: memref<64x32xf32, #tpu.memory_space<vmem>>, %arg11: memref<1x8x32xf32, #tpu.memory_space<vmem>>, %arg12: memref<16x64xf32, #tpu.memory_space<vmem>>, %arg13: memref<16x64xf32, #tpu.memory_space<vmem>>, %arg14: memref<8x64xf32, #tpu.memory_space<vmem>>, %arg15: memref<8x64xf32, #tpu.memory_space<vmem>>, %arg16: memref<8x16xf32, #tpu.memory_space<vmem>>, %arg17: memref<8x16xf32, #tpu.memory_space<vmem>>, %arg18: memref<8x64xf32, #tpu.memory_space<vmem>>, %arg19: memref<8x16x64xf32, #tpu.memory_space<vmem>>, %arg20: memref<8x16x64xf32, #tpu.memory_space<vmem>>, %arg21: memref<8x16x64xf32, #tpu.memory_space<vmem>>) attributes {dimension_semantics = [#tpu.dimension_semantics<parallel>, #tpu.dimension_semantics<arbitrary>], iteration_bounds = array<i64: 2, 1>, scalar_prefetch = 0 : i64, scratch_operands = 10 : i64, tpu.core_type = #tpu.core_type<tc>, window_params = [{transform_indices = @transform_0, window_bounds = array<i64: 1, 8, 32>}, {pipeline_mode = #tpu.pipeline_mode<synchronous>, transform_indices = @transform_1, window_bounds = array<i64: 32, 128>}, {pipeline_mode = #tpu.pipeline_mode<synchronous>, transform_indices = @transform_2, window_bounds = array<i64: 4, 64>}, {pipeline_mode = #tpu.pipeline_mode<synchronous>, transform_indices = @transform_3, window_bounds = array<i64: 1, 64>}, {pipeline_mode = #tpu.pipeline_mode<synchronous>, transform_indices = @transform_4, window_bounds = array<i64: 64, 128>}, {pipeline_mode = #tpu.pipeline_mode<synchronous>, transform_indices = @transform_5, window_bounds = array<i64: 1, 64>}, {pipeline_mode = #tpu.pipeline_mode<synchronous>, transform_indices = @transform_6, window_bounds = array<i64: 16, 64>}, {pipeline_mode = #tpu.pipeline_mode<synchronous>, transform_indices = @transform_7, window_bounds = array<i64: 1, 64>}, {pipeline_mode = #tpu.pipeline_mode<synchronous>, transform_indices = @transform_8, window_bounds = array<i64: 64, 32>}, {transform_indices = @transform_9, window_bounds = array<i64: 1, 8, 32>}]} {
    %c0_i32 = arith.constant 0 : i32
    %0 = arith.cmpi eq, %arg1, %c0_i32 : i32
    %1 = arith.extui %0 : i1 to i32
    %c0_i32_0 = arith.constant 0 : i32
    %2 = arith.cmpi ne, %1, %c0_i32_0 : i32
    scf.if %2 {
      %cst_134 = arith.constant 0.000000e+00 : f32
      %191 = vector.broadcast %cst_134 : f32 to vector<16x64xf32>
      %c0_135 = arith.constant 0 : index
      %c0_136 = arith.constant 0 : index
      %192 = vector.load %arg13[%c0_135, %c0_136] : memref<16x64xf32, #tpu.memory_space<vmem>>, vector<16x64xf32>
      tpu.vector_store %arg13[%c0_135, %c0_136], %191 {strides = array<i32>} : memref<16x64xf32, #tpu.memory_space<vmem>>, vector<16x64xf32>,
      %cst_137 = arith.constant 0.000000e+00 : f32
      %193 = vector.broadcast %cst_137 : f32 to vector<8x64xf32>
      %c0_138 = arith.constant 0 : index
      %c0_139 = arith.constant 0 : index
      %194 = vector.load %arg12[%c0_138, %c0_139] : memref<16x64xf32, #tpu.memory_space<vmem>>, vector<8x64xf32>
      tpu.vector_store %arg12[%c0_138, %c0_139], %193 {strides = array<i32>} : memref<16x64xf32, #tpu.memory_space<vmem>>, vector<8x64xf32>,
    } else {
    }
    %c0 = arith.constant 0 : index
    %c0_1 = arith.constant 0 : index
    %c0_2 = arith.constant 0 : index
    %3 = vector.load %arg2[%c0, %c0_1, %c0_2] : memref<1x8x32xf32, #tpu.memory_space<vmem>>, vector<1x8x32xf32>
    %4 = vector.shape_cast %3 : vector<1x8x32xf32> to vector<8x32xf32>
    %c0_3 = arith.constant 0 : index
    %c0_4 = arith.constant 0 : index
    %5 = vector.load %arg3[%c0_3, %c0_4] : memref<32x128xf32, #tpu.memory_space<vmem>>, vector<32x128xf32>
    %cst = arith.constant dense<0.000000e+00> : vector<8x128xf32>
    %6 = tpu.matmul %4, %5, %cst {dimension_numbers = #tpu.dot_dimension_numbers<[1], [0], [0], [1], [0, 0, 1, 1], [], []>} : vector<8x32xf32>, vector<32x128xf32>, vector<8x128xf32> -> vector<8x128xf32>
    %7 = vector.extract_strided_slice %6 {offsets = [0, 0], sizes = [8, 64], strides = [1, 1]} : vector<8x128xf32> to vector<8x64xf32>
    %8 = vector.extract_strided_slice %6 {offsets = [0, 64], sizes = [8, 64], strides = [1, 1]} : vector<8x128xf32> to vector<8x64xf32>
    %c0_5 = arith.constant 0 : index
    %c0_6 = arith.constant 0 : index
    %9 = vector.load %arg4[%c0_5, %c0_6] : memref<4x64xf32, #tpu.memory_space<vmem>>, vector<4x64xf32>
    %c8 = arith.constant 8 : index
    %c0_7 = arith.constant 0 : index
    %10 = vector.load %arg12[%c8, %c0_7] : memref<16x64xf32, #tpu.memory_space<vmem>>, vector<8x64xf32>
    tpu.vector_store %arg12[%c8, %c0_7], %7 {strides = array<i32>} : memref<16x64xf32, #tpu.memory_space<vmem>>, vector<8x64xf32>,
    %c0_8 = arith.constant 0 : index
    %c0_9 = arith.constant 0 : index
    %11 = vector.load %arg12[%c0_8, %c0_9] : memref<16x64xf32, #tpu.memory_space<vmem>>, vector<16x64xf32>
    %c0_10 = arith.constant 0 : index
    %c0_11 = arith.constant 0 : index
    %12 = vector.load %arg5[%c0_10, %c0_11] : memref<1x64xf32, #tpu.memory_space<vmem>>, vector<1x64xf32>
    %cst_12 = arith.constant 0.000000e+00 : f32
    %13 = vector.broadcast %cst_12 : f32 to vector<8x64xf32>
    %14 = vector.broadcast %12 : vector<1x64xf32> to vector<8x64xf32>
    %15 = arith.addf %14, %13 : vector<8x64xf32>
    %16 = vector.extract_strided_slice %9 {offsets = [0, 0], sizes = [1, 64], strides = [1, 1]} : vector<4x64xf32> to vector<1x64xf32>
    %17 = vector.extract_strided_slice %11 {offsets = [5, 0], sizes = [8, 64], strides = [1, 1]} : vector<16x64xf32> to vector<8x64xf32>
    %18 = vector.broadcast %16 : vector<1x64xf32> to vector<8x64xf32>
    %19 = arith.mulf %18, %17 : vector<8x64xf32>
    %20 = arith.addf %15, %19 : vector<8x64xf32>
    %21 = vector.extract_strided_slice %9 {offsets = [1, 0], sizes = [1, 64], strides = [1, 1]} : vector<4x64xf32> to vector<1x64xf32>
    %22 = vector.extract_strided_slice %11 {offsets = [6, 0], sizes = [8, 64], strides = [1, 1]} : vector<16x64xf32> to vector<8x64xf32>
    %23 = vector.broadcast %21 : vector<1x64xf32> to vector<8x64xf32>
    %24 = arith.mulf %23, %22 : vector<8x64xf32>
    %25 = arith.addf %20, %24 : vector<8x64xf32>
    %26 = vector.extract_strided_slice %9 {offsets = [2, 0], sizes = [1, 64], strides = [1, 1]} : vector<4x64xf32> to vector<1x64xf32>
    %27 = vector.extract_strided_slice %11 {offsets = [7, 0], sizes = [8, 64], strides = [1, 1]} : vector<16x64xf32> to vector<8x64xf32>
    %28 = vector.broadcast %26 : vector<1x64xf32> to vector<8x64xf32>
    %29 = arith.mulf %28, %27 : vector<8x64xf32>
    %30 = arith.addf %25, %29 : vector<8x64xf32>
    %31 = vector.extract_strided_slice %9 {offsets = [3, 0], sizes = [1, 64], strides = [1, 1]} : vector<4x64xf32> to vector<1x64xf32>
    %32 = vector.extract_strided_slice %11 {offsets = [8, 0], sizes = [8, 64], strides = [1, 1]} : vector<16x64xf32> to vector<8x64xf32>
    %33 = vector.broadcast %31 : vector<1x64xf32> to vector<8x64xf32>
    %34 = arith.mulf %33, %32 : vector<8x64xf32>
    %35 = arith.addf %30, %34 : vector<8x64xf32>
    %36 = vector.extract_strided_slice %7 {offsets = [5, 0], sizes = [3, 64], strides = [1, 1]} : vector<8x64xf32> to vector<3x64xf32>
    %c5 = arith.constant 5 : index
    %c0_13 = arith.constant 0 : index
    %37 = vector.load %arg12[%c5, %c0_13] : memref<16x64xf32, #tpu.memory_space<vmem>>, vector<3x64xf32>
    tpu.vector_store %arg12[%c5, %c0_13], %36 {strides = array<i32>} : memref<16x64xf32, #tpu.memory_space<vmem>>, vector<3x64xf32>,
    %cst_14 = arith.constant 1.250000e-01 : f32
    %38 = vector.broadcast %cst_14 : f32 to vector<8x64xf32>
    %39 = arith.mulf %38, %35 : vector<8x64xf32>
    %40 = arith.mulf %39, %35 : vector<8x64xf32>
    %cst_15 = arith.constant 5.000000e-01 : f32
    %41 = vector.broadcast %cst_15 : f32 to vector<8x64xf32>
    %42 = arith.mulf %41, %35 : vector<8x64xf32>
    %43 = arith.addf %40, %42 : vector<8x64xf32>
    %cst_16 = arith.constant 1.250000e-01 : f32
    %44 = vector.broadcast %cst_16 : f32 to vector<8x64xf32>
    %45 = arith.addf %43, %44 : vector<8x64xf32>
    %c0_17 = arith.constant 0 : index
    %c0_18 = arith.constant 0 : index
    %46 = vector.load %arg6[%c0_17, %c0_18] : memref<64x128xf32, #tpu.memory_space<vmem>>, vector<64x128xf32>
    %cst_19 = arith.constant dense<0.000000e+00> : vector<8x128xf32>
    %47 = tpu.matmul %45, %46, %cst_19 {dimension_numbers = #tpu.dot_dimension_numbers<[1], [0], [0], [1], [0, 0, 1, 1], [], []>} : vector<8x64xf32>, vector<64x128xf32>, vector<8x128xf32> -> vector<8x128xf32>
    %48 = vector.extract_strided_slice %47 {offsets = [0, 0], sizes = [8, 64], strides = [1, 1]} : vector<8x128xf32> to vector<8x64xf32>
    %c0_20 = arith.constant 0 : index
    %c0_21 = arith.constant 0 : index
    %49 = vector.load %arg7[%c0_20, %c0_21] : memref<1x64xf32, #tpu.memory_space<vmem>>, vector<1x64xf32>
    %50 = vector.broadcast %49 : vector<1x64xf32> to vector<8x64xf32>
    %51 = arith.addf %48, %50 : vector<8x64xf32>
    %cst_22 = arith.constant 6.250000e-02 : f32
    %52 = vector.broadcast %cst_22 : f32 to vector<8x64xf32>
    %53 = arith.mulf %52, %51 : vector<8x64xf32>
    %54 = arith.mulf %53, %51 : vector<8x64xf32>
    %cst_23 = arith.constant 5.000000e-01 : f32
    %55 = vector.broadcast %cst_23 : f32 to vector<8x64xf32>
    %56 = arith.mulf %55, %51 : vector<8x64xf32>
    %57 = arith.addf %54, %56 : vector<8x64xf32>
    %cst_24 = arith.constant 1.000000e+00 : f32
    %58 = vector.broadcast %cst_24 : f32 to vector<8x64xf32>
    %59 = arith.addf %57, %58 : vector<8x64xf32>
    %c0_25 = arith.constant 0 : index
    %c0_26 = arith.constant 0 : index
    %60 = vector.load %arg14[%c0_25, %c0_26] : memref<8x64xf32, #tpu.memory_space<vmem>>, vector<8x64xf32>
    tpu.vector_store %arg14[%c0_25, %c0_26], %59 {strides = array<i32>} : memref<8x64xf32, #tpu.memory_space<vmem>>, vector<8x64xf32>,
    %61 = arith.mulf %59, %45 : vector<8x64xf32>
    %c0_27 = arith.constant 0 : index
    %c0_28 = arith.constant 0 : index
    %62 = vector.load %arg15[%c0_27, %c0_28] : memref<8x64xf32, #tpu.memory_space<vmem>>, vector<8x64xf32>
    tpu.vector_store %arg15[%c0_27, %c0_28], %61 {strides = array<i32>} : memref<8x64xf32, #tpu.memory_space<vmem>>, vector<8x64xf32>,
    %63 = vector.extract_strided_slice %47 {offsets = [0, 64], sizes = [8, 16], strides = [1, 1]} : vector<8x128xf32> to vector<8x16xf32>
    %c0_29 = arith.constant 0 : index
    %c0_30 = arith.constant 0 : index
    %64 = vector.load %arg16[%c0_29, %c0_30] : memref<8x16xf32, #tpu.memory_space<vmem>>, vector<8x16xf32>
    tpu.vector_store %arg16[%c0_29, %c0_30], %63 {strides = array<i32>} : memref<8x16xf32, #tpu.memory_space<vmem>>, vector<8x16xf32>,
    %65 = vector.extract_strided_slice %47 {offsets = [0, 80], sizes = [8, 16], strides = [1, 1]} : vector<8x128xf32> to vector<8x16xf32>
    %c0_31 = arith.constant 0 : index
    %c0_32 = arith.constant 0 : index
    %66 = vector.load %arg17[%c0_31, %c0_32] : memref<8x16xf32, #tpu.memory_space<vmem>>, vector<8x16xf32>
    tpu.vector_store %arg17[%c0_31, %c0_32], %65 {strides = array<i32>} : memref<8x16xf32, #tpu.memory_space<vmem>>, vector<8x16xf32>,
    %c0_33 = arith.constant 0 : index
    %c0_34 = arith.constant 0 : index
    %67 = vector.load %arg13[%c0_33, %c0_34] : memref<16x64xf32, #tpu.memory_space<vmem>>, vector<16x64xf32>
    %c0_i32_35 = arith.constant 0 : i32
    %c8_i32 = arith.constant 8 : i32
    %68 = arith.muli %c0_i32_35, %c8_i32 : i32
    %69 = tpu.assume_multiple %68, 8 : i32
    %70 = arith.index_cast %69 : i32 to index
    %c0_36 = arith.constant 0 : index
    %71 = vector.load %arg14[%70, %c0_36] : memref<8x64xf32, #tpu.memory_space<vmem>>, vector<8x64xf32>
    %72 = arith.index_cast %69 : i32 to index
    %c0_37 = arith.constant 0 : index
    %73 = vector.load %arg15[%72, %c0_37] : memref<8x64xf32, #tpu.memory_space<vmem>>, vector<8x64xf32>
    %74 = arith.index_cast %69 : i32 to index
    %c0_38 = arith.constant 0 : index
    %75 = vector.load %arg16[%74, %c0_38] : memref<8x16xf32, #tpu.memory_space<vmem>>, vector<8x16xf32>
    %76 = arith.index_cast %69 : i32 to index
    %c0_39 = arith.constant 0 : index
    %77 = vector.load %arg17[%76, %c0_39] : memref<8x16xf32, #tpu.memory_space<vmem>>, vector<8x16xf32>
    %c0_40 = arith.constant 0 : index
    %c0_41 = arith.constant 0 : index
    %78 = vector.load %arg8[%c0_40, %c0_41] : memref<16x64xf32, #tpu.memory_space<vmem>>, vector<16x64xf32>
    %79 = vector.shape_cast %71 : vector<8x64xf32> to vector<8x1x64xf32>
    %80 = vector.shape_cast %78 : vector<16x64xf32> to vector<1x16x64xf32>
    %81 = vector.broadcast %79 : vector<8x1x64xf32> to vector<8x16x64xf32>
    %82 = vector.broadcast %80 : vector<1x16x64xf32> to vector<8x16x64xf32>
    %83 = arith.mulf %81, %82 : vector<8x16x64xf32>
    %84 = math.exp %83 : vector<8x16x64xf32>
    %c0_42 = arith.constant 0 : index
    %c0_43 = arith.constant 0 : index
    %c0_44 = arith.constant 0 : index
    %85 = vector.load %arg19[%c0_42, %c0_43, %c0_44] : memref<8x16x64xf32, #tpu.memory_space<vmem>>, vector<8x16x64xf32>
    tpu.vector_store %arg19[%c0_42, %c0_43, %c0_44], %84 {strides = array<i32>} : memref<8x16x64xf32, #tpu.memory_space<vmem>>, vector<8x16x64xf32>,
    %86 = vector.shape_cast %75 : vector<8x16xf32> to vector<8x16x1xf32>
    %87 = vector.shape_cast %73 : vector<8x64xf32> to vector<8x1x64xf32>
    %88 = vector.broadcast %86 : vector<8x16x1xf32> to vector<8x16x64xf32>
    %89 = vector.broadcast %87 : vector<8x1x64xf32> to vector<8x16x64xf32>
    %90 = arith.mulf %88, %89 : vector<8x16x64xf32>
    %c0_45 = arith.constant 0 : index
    %c0_46 = arith.constant 0 : index
    %c0_47 = arith.constant 0 : index
    %91 = vector.load %arg20[%c0_45, %c0_46, %c0_47] : memref<8x16x64xf32, #tpu.memory_space<vmem>>, vector<8x16x64xf32>
    tpu.vector_store %arg20[%c0_45, %c0_46, %c0_47], %90 {strides = array<i32>} : memref<8x16x64xf32, #tpu.memory_space<vmem>>, vector<8x16x64xf32>,
    %c0_48 = arith.constant 0 : index
    %c0_49 = arith.constant 0 : index
    %c0_50 = arith.constant 0 : index
    %92 = vector.load %arg19[%c0_48, %c0_49, %c0_50] : memref<8x16x64xf32, #tpu.memory_space<vmem>>, vector<1x16x64xf32>
    %93 = vector.shape_cast %92 : vector<1x16x64xf32> to vector<16x64xf32>
    %94 = arith.mulf %93, %67 : vector<16x64xf32>
    %c0_51 = arith.constant 0 : index
    %c0_52 = arith.constant 0 : index
    %c0_53 = arith.constant 0 : index
    %95 = vector.load %arg20[%c0_51, %c0_52, %c0_53] : memref<8x16x64xf32, #tpu.memory_space<vmem>>, vector<1x16x64xf32>
    %96 = vector.shape_cast %95 : vector<1x16x64xf32> to vector<16x64xf32>
    %97 = arith.addf %94, %96 : vector<16x64xf32>
    %c0_54 = arith.constant 0 : index
    %c0_55 = arith.constant 0 : index
    %c0_56 = arith.constant 0 : index
    %98 = vector.load %arg21[%c0_54, %c0_55, %c0_56] : memref<8x16x64xf32, #tpu.memory_space<vmem>>, vector<1x16x64xf32>
    %99 = vector.shape_cast %98 : vector<1x16x64xf32> to vector<16x64xf32>
    %100 = vector.shape_cast %97 : vector<16x64xf32> to vector<1x16x64xf32>
    tpu.vector_store %arg21[%c0_54, %c0_55, %c0_56], %100 {strides = array<i32>} : memref<8x16x64xf32, #tpu.memory_space<vmem>>, vector<1x16x64xf32>,
    %c1 = arith.constant 1 : index
    %c0_57 = arith.constant 0 : index
    %c0_58 = arith.constant 0 : index
    %101 = vector.load %arg19[%c1, %c0_57, %c0_58] : memref<8x16x64xf32, #tpu.memory_space<vmem>>, vector<1x16x64xf32>
    %102 = vector.shape_cast %101 : vector<1x16x64xf32> to vector<16x64xf32>
    %103 = arith.mulf %102, %97 : vector<16x64xf32>
    %c1_59 = arith.constant 1 : index
    %c0_60 = arith.constant 0 : index
    %c0_61 = arith.constant 0 : index
    %104 = vector.load %arg20[%c1_59, %c0_60, %c0_61] : memref<8x16x64xf32, #tpu.memory_space<vmem>>, vector<1x16x64xf32>
    %105 = vector.shape_cast %104 : vector<1x16x64xf32> to vector<16x64xf32>
    %106 = arith.addf %103, %105 : vector<16x64xf32>
    %c1_62 = arith.constant 1 : index
    %c0_63 = arith.constant 0 : index
    %c0_64 = arith.constant 0 : index
    %107 = vector.load %arg21[%c1_62, %c0_63, %c0_64] : memref<8x16x64xf32, #tpu.memory_space<vmem>>, vector<1x16x64xf32>
    %108 = vector.shape_cast %107 : vector<1x16x64xf32> to vector<16x64xf32>
    %109 = vector.shape_cast %106 : vector<16x64xf32> to vector<1x16x64xf32>
    tpu.vector_store %arg21[%c1_62, %c0_63, %c0_64], %109 {strides = array<i32>} : memref<8x16x64xf32, #tpu.memory_space<vmem>>, vector<1x16x64xf32>,
    %c2 = arith.constant 2 : index
    %c0_65 = arith.constant 0 : index
    %c0_66 = arith.constant 0 : index
    %110 = vector.load %arg19[%c2, %c0_65, %c0_66] : memref<8x16x64xf32, #tpu.memory_space<vmem>>, vector<1x16x64xf32>
    %111 = vector.shape_cast %110 : vector<1x16x64xf32> to vector<16x64xf32>
    %112 = arith.mulf %111, %106 : vector<16x64xf32>
    %c2_67 = arith.constant 2 : index
    %c0_68 = arith.constant 0 : index
    %c0_69 = arith.constant 0 : index
    %113 = vector.load %arg20[%c2_67, %c0_68, %c0_69] : memref<8x16x64xf32, #tpu.memory_space<vmem>>, vector<1x16x64xf32>
    %114 = vector.shape_cast %113 : vector<1x16x64xf32> to vector<16x64xf32>
    %115 = arith.addf %112, %114 : vector<16x64xf32>
    %c2_70 = arith.constant 2 : index
    %c0_71 = arith.constant 0 : index
    %c0_72 = arith.constant 0 : index
    %116 = vector.load %arg21[%c2_70, %c0_71, %c0_72] : memref<8x16x64xf32, #tpu.memory_space<vmem>>, vector<1x16x64xf32>
    %117 = vector.shape_cast %116 : vector<1x16x64xf32> to vector<16x64xf32>
    %118 = vector.shape_cast %115 : vector<16x64xf32> to vector<1x16x64xf32>
    tpu.vector_store %arg21[%c2_70, %c0_71, %c0_72], %118 {strides = array<i32>} : memref<8x16x64xf32, #tpu.memory_space<vmem>>, vector<1x16x64xf32>,
    %c3 = arith.constant 3 : index
    %c0_73 = arith.constant 0 : index
    %c0_74 = arith.constant 0 : index
    %119 = vector.load %arg19[%c3, %c0_73, %c0_74] : memref<8x16x64xf32, #tpu.memory_space<vmem>>, vector<1x16x64xf32>
    %120 = vector.shape_cast %119 : vector<1x16x64xf32> to vector<16x64xf32>
    %121 = arith.mulf %120, %115 : vector<16x64xf32>
    %c3_75 = arith.constant 3 : index
    %c0_76 = arith.constant 0 : index
    %c0_77 = arith.constant 0 : index
    %122 = vector.load %arg20[%c3_75, %c0_76, %c0_77] : memref<8x16x64xf32, #tpu.memory_space<vmem>>, vector<1x16x64xf32>
    %123 = vector.shape_cast %122 : vector<1x16x64xf32> to vector<16x64xf32>
    %124 = arith.addf %121, %123 : vector<16x64xf32>
    %c3_78 = arith.constant 3 : index
    %c0_79 = arith.constant 0 : index
    %c0_80 = arith.constant 0 : index
    %125 = vector.load %arg21[%c3_78, %c0_79, %c0_80] : memref<8x16x64xf32, #tpu.memory_space<vmem>>, vector<1x16x64xf32>
    %126 = vector.shape_cast %125 : vector<1x16x64xf32> to vector<16x64xf32>
    %127 = vector.shape_cast %124 : vector<16x64xf32> to vector<1x16x64xf32>
    tpu.vector_store %arg21[%c3_78, %c0_79, %c0_80], %127 {strides = array<i32>} : memref<8x16x64xf32, #tpu.memory_space<vmem>>, vector<1x16x64xf32>,
    %c4 = arith.constant 4 : index
    %c0_81 = arith.constant 0 : index
    %c0_82 = arith.constant 0 : index
    %128 = vector.load %arg19[%c4, %c0_81, %c0_82] : memref<8x16x64xf32, #tpu.memory_space<vmem>>, vector<1x16x64xf32>
    %129 = vector.shape_cast %128 : vector<1x16x64xf32> to vector<16x64xf32>
    %130 = arith.mulf %129, %124 : vector<16x64xf32>
    %c4_83 = arith.constant 4 : index
    %c0_84 = arith.constant 0 : index
    %c0_85 = arith.constant 0 : index
    %131 = vector.load %arg20[%c4_83, %c0_84, %c0_85] : memref<8x16x64xf32, #tpu.memory_space<vmem>>, vector<1x16x64xf32>
    %132 = vector.shape_cast %131 : vector<1x16x64xf32> to vector<16x64xf32>
    %133 = arith.addf %130, %132 : vector<16x64xf32>
    %c4_86 = arith.constant 4 : index
    %c0_87 = arith.constant 0 : index
    %c0_88 = arith.constant 0 : index
    %134 = vector.load %arg21[%c4_86, %c0_87, %c0_88] : memref<8x16x64xf32, #tpu.memory_space<vmem>>, vector<1x16x64xf32>
    %135 = vector.shape_cast %134 : vector<1x16x64xf32> to vector<16x64xf32>
    %136 = vector.shape_cast %133 : vector<16x64xf32> to vector<1x16x64xf32>
    tpu.vector_store %arg21[%c4_86, %c0_87, %c0_88], %136 {strides = array<i32>} : memref<8x16x64xf32, #tpu.memory_space<vmem>>, vector<1x16x64xf32>,
    %c5_89 = arith.constant 5 : index
    %c0_90 = arith.constant 0 : index
    %c0_91 = arith.constant 0 : index
    %137 = vector.load %arg19[%c5_89, %c0_90, %c0_91] : memref<8x16x64xf32, #tpu.memory_space<vmem>>, vector<1x16x64xf32>
    %138 = vector.shape_cast %137 : vector<1x16x64xf32> to vector<16x64xf32>
    %139 = arith.mulf %138, %133 : vector<16x64xf32>
    %c5_92 = arith.constant 5 : index
    %c0_93 = arith.constant 0 : index
    %c0_94 = arith.constant 0 : index
    %140 = vector.load %arg20[%c5_92, %c0_93, %c0_94] : memref<8x16x64xf32, #tpu.memory_space<vmem>>, vector<1x16x64xf32>
    %141 = vector.shape_cast %140 : vector<1x16x64xf32> to vector<16x64xf32>
    %142 = arith.addf %139, %141 : vector<16x64xf32>
    %c5_95 = arith.constant 5 : index
    %c0_96 = arith.constant 0 : index
    %c0_97 = arith.constant 0 : index
    %143 = vector.load %arg21[%c5_95, %c0_96, %c0_97] : memref<8x16x64xf32, #tpu.memory_space<vmem>>, vector<1x16x64xf32>
    %144 = vector.shape_cast %143 : vector<1x16x64xf32> to vector<16x64xf32>
    %145 = vector.shape_cast %142 : vector<16x64xf32> to vector<1x16x64xf32>
    tpu.vector_store %arg21[%c5_95, %c0_96, %c0_97], %145 {strides = array<i32>} : memref<8x16x64xf32, #tpu.memory_space<vmem>>, vector<1x16x64xf32>,
    %c6 = arith.constant 6 : index
    %c0_98 = arith.constant 0 : index
    %c0_99 = arith.constant 0 : index
    %146 = vector.load %arg19[%c6, %c0_98, %c0_99] : memref<8x16x64xf32, #tpu.memory_space<vmem>>, vector<1x16x64xf32>
    %147 = vector.shape_cast %146 : vector<1x16x64xf32> to vector<16x64xf32>
    %148 = arith.mulf %147, %142 : vector<16x64xf32>
    %c6_100 = arith.constant 6 : index
    %c0_101 = arith.constant 0 : index
    %c0_102 = arith.constant 0 : index
    %149 = vector.load %arg20[%c6_100, %c0_101, %c0_102] : memref<8x16x64xf32, #tpu.memory_space<vmem>>, vector<1x16x64xf32>
    %150 = vector.shape_cast %149 : vector<1x16x64xf32> to vector<16x64xf32>
    %151 = arith.addf %148, %150 : vector<16x64xf32>
    %c6_103 = arith.constant 6 : index
    %c0_104 = arith.constant 0 : index
    %c0_105 = arith.constant 0 : index
    %152 = vector.load %arg21[%c6_103, %c0_104, %c0_105] : memref<8x16x64xf32, #tpu.memory_space<vmem>>, vector<1x16x64xf32>
    %153 = vector.shape_cast %152 : vector<1x16x64xf32> to vector<16x64xf32>
    %154 = vector.shape_cast %151 : vector<16x64xf32> to vector<1x16x64xf32>
    tpu.vector_store %arg21[%c6_103, %c0_104, %c0_105], %154 {strides = array<i32>} : memref<8x16x64xf32, #tpu.memory_space<vmem>>, vector<1x16x64xf32>,
    %c7 = arith.constant 7 : index
    %c0_106 = arith.constant 0 : index
    %c0_107 = arith.constant 0 : index
    %155 = vector.load %arg19[%c7, %c0_106, %c0_107] : memref<8x16x64xf32, #tpu.memory_space<vmem>>, vector<1x16x64xf32>
    %156 = vector.shape_cast %155 : vector<1x16x64xf32> to vector<16x64xf32>
    %157 = arith.mulf %156, %151 : vector<16x64xf32>
    %c7_108 = arith.constant 7 : index
    %c0_109 = arith.constant 0 : index
    %c0_110 = arith.constant 0 : index
    %158 = vector.load %arg20[%c7_108, %c0_109, %c0_110] : memref<8x16x64xf32, #tpu.memory_space<vmem>>, vector<1x16x64xf32>
    %159 = vector.shape_cast %158 : vector<1x16x64xf32> to vector<16x64xf32>
    %160 = arith.addf %157, %159 : vector<16x64xf32>
    %c7_111 = arith.constant 7 : index
    %c0_112 = arith.constant 0 : index
    %c0_113 = arith.constant 0 : index
    %161 = vector.load %arg21[%c7_111, %c0_112, %c0_113] : memref<8x16x64xf32, #tpu.memory_space<vmem>>, vector<1x16x64xf32>
    %162 = vector.shape_cast %161 : vector<1x16x64xf32> to vector<16x64xf32>
    %163 = vector.shape_cast %160 : vector<16x64xf32> to vector<1x16x64xf32>
    tpu.vector_store %arg21[%c7_111, %c0_112, %c0_113], %163 {strides = array<i32>} : memref<8x16x64xf32, #tpu.memory_space<vmem>>, vector<1x16x64xf32>,
    %164 = vector.shape_cast %77 : vector<8x16xf32> to vector<8x16x1xf32>
    %c0_114 = arith.constant 0 : index
    %c0_115 = arith.constant 0 : index
    %c0_116 = arith.constant 0 : index
    %165 = vector.load %arg21[%c0_114, %c0_115, %c0_116] : memref<8x16x64xf32, #tpu.memory_space<vmem>>, vector<8x16x64xf32>
    %166 = vector.broadcast %164 : vector<8x16x1xf32> to vector<8x16x64xf32>
    %167 = arith.mulf %166, %165 : vector<8x16x64xf32>
    %cst_117 = arith.constant dense<0.000000e+00> : vector<8x64xf32>
    %168 = vector.multi_reduction <add>, %167, %cst_117 [1] : vector<8x16x64xf32> to vector<8x64xf32>
    %169 = arith.index_cast %69 : i32 to index
    %c0_118 = arith.constant 0 : index
    %170 = vector.load %arg18[%169, %c0_118] : memref<8x64xf32, #tpu.memory_space<vmem>>, vector<8x64xf32>
    tpu.vector_store %arg18[%169, %c0_118], %168 {strides = array<i32>} : memref<8x64xf32, #tpu.memory_space<vmem>>, vector<8x64xf32>,
    %c1_i32 = arith.constant 1 : i32
    %c0_119 = arith.constant 0 : index
    %c0_120 = arith.constant 0 : index
    %171 = vector.load %arg13[%c0_119, %c0_120] : memref<16x64xf32, #tpu.memory_space<vmem>>, vector<16x64xf32>
    tpu.vector_store %arg13[%c0_119, %c0_120], %160 {strides = array<i32>} : memref<16x64xf32, #tpu.memory_space<vmem>>, vector<16x64xf32>,
    %c0_121 = arith.constant 0 : index
    %c0_122 = arith.constant 0 : index
    %172 = vector.load %arg18[%c0_121, %c0_122] : memref<8x64xf32, #tpu.memory_space<vmem>>, vector<8x64xf32>
    %c0_123 = arith.constant 0 : index
    %c0_124 = arith.constant 0 : index
    %173 = vector.load %arg9[%c0_123, %c0_124] : memref<1x64xf32, #tpu.memory_space<vmem>>, vector<1x64xf32>
    %174 = vector.broadcast %173 : vector<1x64xf32> to vector<8x64xf32>
    %175 = arith.mulf %174, %45 : vector<8x64xf32>
    %176 = arith.addf %172, %175 : vector<8x64xf32>
    %cst_125 = arith.constant 1.250000e-01 : f32
    %177 = vector.broadcast %cst_125 : f32 to vector<8x64xf32>
    %178 = arith.mulf %177, %8 : vector<8x64xf32>
    %179 = arith.mulf %178, %8 : vector<8x64xf32>
    %cst_126 = arith.constant 5.000000e-01 : f32
    %180 = vector.broadcast %cst_126 : f32 to vector<8x64xf32>
    %181 = arith.mulf %180, %8 : vector<8x64xf32>
    %182 = arith.addf %179, %181 : vector<8x64xf32>
    %cst_127 = arith.constant 1.250000e-01 : f32
    %183 = vector.broadcast %cst_127 : f32 to vector<8x64xf32>
    %184 = arith.addf %182, %183 : vector<8x64xf32>
    %185 = arith.mulf %176, %184 : vector<8x64xf32>
    %c0_128 = arith.constant 0 : index
    %c0_129 = arith.constant 0 : index
    %186 = vector.load %arg10[%c0_128, %c0_129] : memref<64x32xf32, #tpu.memory_space<vmem>>, vector<64x32xf32>
    %cst_130 = arith.constant dense<0.000000e+00> : vector<8x32xf32>
    %187 = tpu.matmul %185, %186, %cst_130 {dimension_numbers = #tpu.dot_dimension_numbers<[1], [0], [0], [1], [0, 0, 1, 1], [], []>} : vector<8x64xf32>, vector<64x32xf32>, vector<8x32xf32> -> vector<8x32xf32>
    %188 = arith.addf %187, %4 : vector<8x32xf32>
    %189 = vector.shape_cast %188 : vector<8x32xf32> to vector<1x8x32xf32>
    %c0_131 = arith.constant 0 : index
    %c0_132 = arith.constant 0 : index
    %c0_133 = arith.constant 0 : index
    %190 = vector.load %arg11[%c0_131, %c0_132, %c0_133] : memref<1x8x32xf32, #tpu.memory_space<vmem>>, vector<1x8x32xf32>
    tpu.vector_store %arg11[%c0_131, %c0_132, %c0_133], %189 {strides = array<i32>} : memref<1x8x32xf32, #tpu.memory_space<vmem>>, vector<1x8x32xf32>,
    return
  }
  func.func @transform_0(%arg0: i32, %arg1: i32) -> (i32, i32, i32) {
    %c0_i32 = arith.constant 0 : i32
    %c0_i32_0 = arith.constant 0 : i32
    return %arg0, %arg1, %c0_i32 : i32, i32, i32
  }
  func.func @transform_1(%arg0: i32, %arg1: i32) -> (i32, i32) {
    %c0_i32 = arith.constant 0 : i32
    %c0_i32_0 = arith.constant 0 : i32
    %c0_i32_1 = arith.constant 0 : i32
    return %c0_i32, %c0_i32_0 : i32, i32
  }
  func.func @transform_2(%arg0: i32, %arg1: i32) -> (i32, i32) {
    %c0_i32 = arith.constant 0 : i32
    %c0_i32_0 = arith.constant 0 : i32
    %c0_i32_1 = arith.constant 0 : i32
    return %c0_i32, %c0_i32_0 : i32, i32
  }
  func.func @transform_3(%arg0: i32, %arg1: i32) -> (i32, i32) {
    %c0_i32 = arith.constant 0 : i32
    %c0_i32_0 = arith.constant 0 : i32
    %c0_i32_1 = arith.constant 0 : i32
    return %c0_i32, %c0_i32_0 : i32, i32
  }
  func.func @transform_4(%arg0: i32, %arg1: i32) -> (i32, i32) {
    %c0_i32 = arith.constant 0 : i32
    %c0_i32_0 = arith.constant 0 : i32
    %c0_i32_1 = arith.constant 0 : i32
    return %c0_i32, %c0_i32_0 : i32, i32
  }
  func.func @transform_5(%arg0: i32, %arg1: i32) -> (i32, i32) {
    %c0_i32 = arith.constant 0 : i32
    %c0_i32_0 = arith.constant 0 : i32
    %c0_i32_1 = arith.constant 0 : i32
    return %c0_i32, %c0_i32_0 : i32, i32
  }
  func.func @transform_6(%arg0: i32, %arg1: i32) -> (i32, i32) {
    %c0_i32 = arith.constant 0 : i32
    %c0_i32_0 = arith.constant 0 : i32
    %c0_i32_1 = arith.constant 0 : i32
    return %c0_i32, %c0_i32_0 : i32, i32
  }
  func.func @transform_7(%arg0: i32, %arg1: i32) -> (i32, i32) {
    %c0_i32 = arith.constant 0 : i32
    %c0_i32_0 = arith.constant 0 : i32
    %c0_i32_1 = arith.constant 0 : i32
    return %c0_i32, %c0_i32_0 : i32, i32
  }
  func.func @transform_8(%arg0: i32, %arg1: i32) -> (i32, i32) {
    %c0_i32 = arith.constant 0 : i32
    %c0_i32_0 = arith.constant 0 : i32
    %c0_i32_1 = arith.constant 0 : i32
    return %c0_i32, %c0_i32_0 : i32, i32
  }
  func.func @transform_9(%arg0: i32, %arg1: i32) -> (i32, i32, i32) {
    %c0_i32 = arith.constant 0 : i32
    %c0_i32_0 = arith.constant 0 : i32
    return %arg0, %arg1, %c0_i32 : i32, i32, i32
  }
}

</mosaic_0001>

<bundles_post_ra>
// kernel: tpu_custom_call.1
= control target key start
LH: loop header
LB: loop body
LE: loop exit
PB: predicated region body
PF: predicated region fallthrough
CT: control target
= control target key end

     0   :  { %s2092_s0 = inlined_call_operand.hbm [shape: f32[2,8,32], index: 0, kind: input, shape index: {}]   ;;  %s2093_s1 = inlined_call_operand.vmem [shape: f32[32,128], index: 1, kind: input, shape index: {}]   ;;  %s2094_s2 = inlined_call_operand.hbm [shape: f32[4,64], index: 2, kind: input, shape index: {}]   ;;  %s2095_s3 = inlined_call_operand.vmem [shape: f32[1,64], index: 3, kind: input, shape index: {}]   ;;  %s2096_s4 = inlined_call_operand.vmem [shape: f32[64,128], index: 4, kind: input, shape index: {}]   ;;  %s2097_s5 = inlined_call_operand.vmem [shape: f32[1,64], index: 5, kind: input, shape index: {}]   ;;  %s2098_s6 = inlined_call_operand.hbm [shape: f32[16,64], index: 6, kind: input, shape index: {}]   ;;  %s2099_s7 = inlined_call_operand.vmem [shape: f32[1,64], index: 7, kind: input, shape index: {}]   ;;  %s2100_s8 = inlined_call_operand.vmem [shape: f32[64,32], index: 8, kind: input, shape index: {}]   ;;  %s2101_s9 = inlined_call_operand.hbm [shape: f32[2,8,32], index: 9, kind: output, shape index: {}]  }
   0x1   :  { %2104 = sst [smem:[#allocation24_spill]] %s2094_s2 }
   0x2   :  { %2105 = sst [smem:[#allocation25_spill]] %s2098_s6 }
   0x3   :  { %14 = vsyncpa [#allocation13], 0 }
   0x4   :  { %16 = vsyncpa [#allocation13 + $0x1], 0 }
   0x5   :  { %17 = vsyncpa [#allocation16], 0 }
   0x6   :  { %18 = vsyncpa [#allocation14], 0 }
   0x7   :  { %20 = vsyncpa [#allocation14 + $0x1], 0  ;;  %s1718_s30 = smov 0   ;;  %s1720_s10 = smov 0  }
   0x8   :  { %s1722_s11 = smov 0   ;;  %s1724_s12 = smov 0  }
   0x9   :  { %s1726_s13 = smov 0   ;;  %s1728_s14 = smov 0  }
   0xa LB: > { %2106 = sst [smem:[#allocation22_spill]] %s1639_s30  ;;  %s1318_s15 = sadd.s32 4294967295, %s1659_s14   ;;  %s1659_s14 = sphi %s1728_s14, %s26_s14   ;;  %s1655_s13 = sphi %s1726_s13, %s2121_s13   ;;  %s1651_s12 = sphi %s1724_s12, %s2120_s12   ;;  %s1647_s11 = sphi %s1722_s11, %s2119_s11   ;;  %s1643_s10 = sphi %s1720_s10, %s2118_s10   ;;  %s1639_s30 = sphi %s1718_s30, %s2117_s30  }
   0xb   : > { %s1319_s16 = sadd.s32 4294967294, %s1659_s14   ;;  %p60_p0 = scmp.ne.s32.totalorder %s1643_s10, %s1639_s30 }
   0xc   : > { %p1754_p1 = scmp.eq.s32.totalorder %s1318_s15, 0  ;;  %p260_p2 = scmp.eq.s32.totalorder %s1319_s16, 1 }
   0xd   : > { %p1320_p4 = scmp.ge.s32.totalorder %s1659_s14, 1  ;;  %p267_p6 = scmp.lt.s32.totalorder %s1659_s14, 3 }
   0xe   : > { %p1760_p3 = por %p1754_p1, %p60_p0  ;;  %p1765_p5 = por %p260_p2, %p60_p0 }
   0xf   : > { %s2111_s2 = sld [smem:[#allocation24_spill]]  ;;  %p1773_p7 = pnand %p1320_p4, %p267_p6 }
  0x10   : > { %s2109_s19 = scalar_select %p1765_p5, 1, 0 }
  0x11   : > { %p1323_p8 = scmp.ge.s32.totalorder %s1659_s14, 2  ;;  %p1350_p9 = pneg %p1773_p7 }
  0x12   : > { %2110 = sst [smem:[#allocation23_spill]] %s2109_s19  ;;  %s1661_s24 = smov [#allocation15]  }
  0x13   : > { %s284_s25 = sshll.u32 %s1661_s24, 4  ;;  %s2113_s6 = sld [smem:[#allocation25_spill]]  ;;  %s285_s25 = int_to_ptr.vmem [resolvable:$true] %s284_s25 }
  0x14   : > { %p1351_p10 = pnand %p1350_p9, %p1754_p1  ;;  %s1662_s29 = smov [#allocation17]  }
  0x15   : > { %s282_s22 = sshll.u32 %s2111_s2, 4  ;;  %s304_s16 = sshll.u32 %s1662_s29, 4  ;;  %s283_s22 = int_to_ptr.hbm [resolvable:$true] %s282_s22  ;;  %s305_s16 = int_to_ptr.vmem [resolvable:$true] %s304_s16 }
  0x16   : > { %1353 = dma.hbm_to_vmem [thread:$0]  (!%p1351_p10), %s283_s22, 64, %s285_s25, [#allocation16]  }
  0x17   : > { %s1663_s20 = smov 128   ;;  %s1664_s21 = smov 8  }
  0x18   : > { %p254_p11 = scmp.eq.s32.totalorder %s1318_s15, 1  ;;  %s38_s24 = sadd.s32 1, %s1655_s13 }
  0x19   : > { %s302_s28 = sshll.u32 %s2113_s6, 4  ;;  %p40_p12 = scmp.ge.s32.totalorder %s38_s24, 2  ;;  %s303_s28 = int_to_ptr.hbm [resolvable:$true] %s302_s28 }
  0x1a   : > { %1356 = dma.hbm_to_vmem [thread:$0]  (!%p1351_p10), %s303_s28, 256, %s305_s16, [#allocation16], %s1663_s20, %s1663_s20, %s1664_s21  }
  0x1b   : > { %s47_s26 = sadd.s32 1, %s1647_s11  ;;  %p54_p13 = scmp.ne.s32.totalorder %s1647_s11, %s1643_s10 }
  0x1c   : > { %p55_p0 = scmp.eq.s32.totalorder %s1659_s14, 0  ;;  %s2123_s24 = smov (%p40_p12, %s38_s24), 0 }
  0x1d   : > { %p1794_p2 = por %p254_p11, %p54_p13  ;;  %p1367_p4 = scmp.lt.s32.totalorder %s1659_s14, 2 }
  0x1e   : > { %s42_s22 = ssub.s32 %s1655_s13, %s2123_s24  ;;  %s324_s25 = sand.u32 1, %s1647_s11  }
  0x1f   : > { %p45_p6 = scmp.eq.s32.totalorder %s42_s22, 0  ;;  %p56_p9 = por %p55_p0, %p54_p13 }
  0x20   : > { %s1324_s28 = sshll.u32 %s324_s25, 3  ;;  %s1325_s15 = sshll.u32 %s1655_s13, 3 }
  0x21   : > { %s1804_s29 = scalar_select %p45_p6, %s1647_s11, %s47_s26  }
  0x22   : > { %s333_s21 = scalar_lea.hbm %s2092_s0, %s1325_s15  ;;  %s328_s6 = scalar_lea.vmem [#allocation12], %s1324_s28 }
  0x23   : > { %s335_s2 = sshll.u32 %s333_s21, 4  ;;  %s337_s19 = sshll.u32 %s328_s6, 4  ;;  %s336_s2 = int_to_ptr.hbm [resolvable:$true] %s335_s2  ;;  %s338_s19 = int_to_ptr.vmem [resolvable:$true] %s337_s19 }
  0x24   : > { %p1358_p10 = pnand %p1367_p4, %p56_p9  ;;  %s325_s30 = scalar_lea.sflag [#allocation13], %s324_s25 }
  0x25   : > { %346 = sbr.rel (%p1773_p7) target bundleno = 887 (0x377), region = 56  ;;  %s1814_s26 = sand.u32 (!%p1773_p7), 1, %s1643_s10  }
  0x26   : > { %1360 = dma.hbm_to_vmem [thread:$0]  (!%p1358_p10), %s336_s2, 128, %s338_s19, %s325_s30  }
  0x27   : > { %s1327_s22 = sshll.u32 (!%p1773_p7), %s1814_s26, 3  ;;  %s349_s15 = scalar_lea.sflag (!%p1773_p7), [#allocation13], %s1814_s26 }
  0x28   : > { %s1820_s6 = scalar_lea.vmem (!%p1773_p7), [#allocation12], %s1327_s22 }
  0x2a   : > { %1626 = dma.done.wait (%p1760_p3), %s349_s15, 128  }
  0x2b   : > { %1628 = vsyncadd (%p1760_p3), %s349_s15, 4294967168 }
  0x2c   : > { %1630 = dma.done.wait (%p1754_p1), [#allocation16], 320  }
  0x2d   : > { %1632 = vsyncadd (%p1754_p1), [#allocation16], 4294966976  ;;  %vm402_vm0 = vcmask 523264   ;;  %v1665_v0 = vmov 0.0   ;;  %v410_v1 = vld [vmem:[%s2093_s1 + $0x18] sm:$0xff]  ;;  %v409_v2 = vld [vmem:[%s2093_s1 + $0x10] sm:$0xff] }
  0x2e   : > { %403 = vst.msk [vmem:[#allocation3] sm:$0xff] %vm402_vm0, %v1665_v0  ;;  %427 = vmatpush.msra.mxu0 %v410_v1  ;;  %v408_v3 = vld [vmem:[%s2093_s1 + $0x8] sm:$0xff]  ;;  %v407_v4 = vld [vmem:[%s2093_s1] sm:$0xff]  ;;  %vm411_vm1 = vcmask 261120   ;;  %v502_v6 = vld [vmem:[%s2096_s4 + $0x38] sm:$0xff]  ;;  %vm483_vm2 = vcmask 523269  }
  0x2f   : > { %404 = vst.msk [vmem:[#allocation3 + $0x8] sm:$0xff] %vm402_vm0, %v1665_v0  ;;  %v406_v5 = vld [vmem:[%s1820_s6] sm:$0xff]  ;;  %519 = vmatpush.msra.mxu1 %v502_v6  ;;  %v499_v9 = vld [vmem:[%s2096_s4 + $0x20] sm:$0xff]  ;;  %v498_v10 = vld [vmem:[%s2096_s4 + $0x18] sm:$0xff]  ;;  %vm455_vm3 = vcmask 1046528   ;;  %vm468_vm4 = vcmask 1045504  }
  0x30   : > { %405 = vst.msk [vmem:[#allocation2] sm:$0xff] %vm402_vm0, %v1665_v0  ;;  %428 = vmatpush.msra.mxu0 %v409_v2  ;;  %v501_v7 = vld [vmem:[%s2096_s4 + $0x30] sm:$0xff]  ;;  %v500_v8 = vld [vmem:[%s2096_s4 + $0x28] sm:$0xff]  ;;  %v495_v13 = vld [vmem:[%s2096_s4] sm:$0xff]  ;;  %vm505_vm5 = vcmask 1042432   ;;  %s1666_s25 = smov 64  }
  0x31   : > { %520 = vmatpush.msra.mxu1 %v501_v7  ;;  %v497_v11 = vld [vmem:[%s2096_s4 + $0x10] sm:$0xff]  ;;  %v496_v12 = vld [vmem:[%s2096_s4 + $0x8] sm:$0xff]  ;;  %v435_v14 = vld [vmem:[#allocation15] sm:$0xf]  ;;  %s1667_s28 = smov 48   ;;  %vm549_vm6 = vcmask 130048  }
  0x32   : > { %429 = vmatpush.msra.mxu0 %v408_v3  ;;  %v450_v17 = vperm.slane %v435_v14, 1  ;;  %v445_v18 = vperm.slane %v435_v14, 0  ;;  %v463_v19 = vperm.slane %v435_v14, 2  ;;  %v1447_v21 = vld [vmem:[%s2095_s3] ss:$0 sm:$0xff]  ;;  %v476_v24 = vperm.slane %v435_v14, 3 }
  0x33   : > { %521 = vmatpush.msra.mxu1 %v500_v8  ;;  %v1449_v52 = vld [vmem:[%s2099_s7] ss:$0 sm:$0xff]  ;;  %v562_v14 = vld [vmem:[#allocation17 + $0x8] sm:$0xff]  ;;  %vm1128_vm7 = vcmask 1041409   ;;  %vm1130_vm8 = vcmask 1042434   ;;  %vm1132_vm9 = vcmask 1043459  }
  0x34   : > { %430 = vmatpush.msra.mxu0 %v407_v4  ;;  %v1448_v0 = vld [vmem:[%s2097_s5] ss:$0 sm:$0xff]  ;;  %vm1134_vm10 = vcmask 1044484   ;;  %vm1136_vm11 = vcmask 1045509   ;;  %vm1138_vm12 = vcmask 1046534   ;;  %vm1140_vm13 = vcmask 1047559  }
  0x35   : > { %1331 = vmatmul.msk.f32.vlgmr.msra.gmra.mxu0 %vm411_vm1, %v406_v5  ;;  %522 = vmatpush.msra.mxu1 %v499_v9  ;;  %s1335_s2 = sshll.u32 %s1651_s12, 3  ;;  %s397_s17 = scalar_lea.vmem [#allocation18], %s1327_s22 }
  0x36   : > { %s1214_s19 = scalar_lea.hbm %s2101_s9, %s1335_s2  ;;  %s1216_s23 = sshll.u32 %s397_s17, 4  ;;  %s1217_s23 = int_to_ptr.vmem [resolvable:$true] %s1216_s23 }
  0x37   : > { %523 = vmatpush.msra.mxu1 %v498_v10  ;;  %v438_v15 = vld [vmem:[#allocation2] sm:$0xff]  ;;  %s1593_s22 = scalar_lea.hbm %s2101_s9, 16 }
  0x38   : > { %v451_v20 = vmul.f32 %v450_v17, %v438_v15  ;;  %v446_v22 = vmul.f32 %v445_v18, %v438_v15  ;;  %v464_v23 = vmul.f32 %v463_v19, %v438_v15  ;;  %v561_v10 = vld [vmem:[#allocation17] sm:$0xff] }
  0x39   : > { %524 = vmatpush.msra.mxu1 %v497_v11 }
  0x3a   : > { %v456_v28 = vrot.slane %v451_v20, 1  ;;  %v448_v30 = vadd.f32 %v1447_v21, %v446_v22  ;;  %v469_v31 = vrot.slane %v464_v23, 2 }
  0x3b   : > { %525 = vmatpush.msra.mxu1 %v496_v12 }
  0x3d   : > { %526 = vmatpush.msra.mxu1 %v495_v13 }
  0xb2   : > { %v1871_v16 = vpop.f32.mrf.mxu0 }
  0xb3   : > { %437 = vst.msk [vmem:[#allocation2 + $0x8] sm:$0xff] %vm402_vm0, %v1871_v16 }
  0xb4   : > { %484 = vst.msk [vmem:[#allocation2] sm:$0xe0] %vm483_vm2, %v1871_v16 }
  0xba   : > { %v439_v25 = vld [vmem:[#allocation2 + $0x8] sm:$0xff] }
  0xbb   : > { %v447_v26 = vmul.f32 %v445_v18, %v439_v25  ;;  %v452_v27 = vmul.f32 %v450_v17, %v439_v25  ;;  %v465_v29 = vmul.f32 %v463_v19, %v439_v25  ;;  %v477_v35 = vmul.f32 %v476_v24, %v439_v25 }
  0xbd   : > { %v457_v32 = vrot.slane %v452_v27, 1  ;;  %v449_v33 = vadd.f32 %v1447_v21, %v447_v26  ;;  %v470_v34 = vrot.slane %v465_v29, 2  ;;  %v479_v41 = vrot.slane %v477_v35, 3 }
  0xbf   : > { %v458_v36 = vsel %vm455_vm3, %v456_v28, %v457_v32  ;;  %v462_v37 = vadd.f32 %v457_v32, %v449_v33  ;;  %v471_v39 = vsel %vm468_vm4, %v469_v31, %v470_v34 }
  0xc0   : > { %v461_v38 = vadd.f32 %v458_v36, %v448_v30 }
  0xc1   : > { %v475_v40 = vadd.f32 %v470_v34, %v462_v37 }
  0xc2   : > { %v474_v42 = vadd.f32 %v471_v39, %v461_v38 }
  0xc3   : > { %v482_v43 = vadd.f32 %v479_v41, %v475_v40 }
  0xc4   : > { %v481_v44 = vadd.f32 %v479_v41, %v474_v42 }
  0xc5   : > { %v486_v45 = vmul.f32 0.125, %v482_v43  ;;  %v490_v48 = vmul.f32 0.5, %v482_v43 }
  0xc6   : > { %v485_v46 = vmul.f32 0.125, %v481_v44  ;;  %v489_v50 = vmul.f32 0.5, %v481_v44 }
  0xc7   : > { %v488_v47 = vmul.f32 %v486_v45, %v482_v43 }
  0xc8   : > { %v487_v49 = vmul.f32 %v485_v46, %v481_v44 }
  0xc9   : > { %v492_v51 = vadd.f32 %v490_v48, %v488_v47 }
  0xca   : > { %v491_v53 = vadd.f32 %v489_v50, %v487_v49 }
  0xcb   : > { %v494_v54 = vadd.f32 0.125, %v492_v51 }
  0xcc   : > { %v493_v55 = vadd.f32 0.125, %v491_v53 }
  0xcd   : > { %v507_v56 = vrot.slane %v494_v54, 5  ;;  %v1152_v57 = vmul.f32 %v1449_v52, %v494_v54 }
  0xce   : > { %v506_v58 = vrot.slane %v493_v55, 5  ;;  %v1151_v59 = vmul.f32 %v1449_v52, %v493_v55 }
  0xcf   : > { %v1156_v60 = vrot.slane %v1152_v57, 5 }
  0xd0   : > { %v508_v61 = vsel %vm505_vm5, %v506_v58, %v507_v56  ;;  %v1155_v62 = vrot.slane %v1151_v59, 5 }
  0xd1   : > { %1332 = vmatmul.msk.f32.vlgmr.msra.gmra.mxu1 %vm402_vm0, %v508_v61 }
  0xd2   : > { %v1883_v63 = vsel %vm505_vm5, %v1155_v62, %v1156_v60 }
 0x14e   : > { %v528_v1 = vpop.f32.mrf.mxu1 }
 0x14f   : > { %v535_v2 = vadd.f32 %v1448_v0, %v528_v1  ;;  %546 = vrot.lane.b32.xlu0 %v528_v1, %s1666_s25 }
 0x151   : > { %v536_v3 = vmul.f32 0.0625, %v535_v2  ;;  %v538_v5 = vmul.f32 0.5, %v535_v2 }
 0x153   : > { %v537_v4 = vmul.f32 %v536_v3, %v535_v2 }
 0x155   : > { %v539_v6 = vadd.f32 %v538_v5, %v537_v4 }
 0x157   : > { %v540_v7 = vadd.f32 1.0, %v539_v6  ;;  %551 = vrot.lane.b32.xlu0 %v528_v1, %s1667_s28  ;;  %s1203_s28 = scalar_lea.sflag [#allocation14], %s1814_s26 }
 0x159   : > { %541 = vst.msk [vmem:[#allocation4] sm:$0xff] %vm402_vm0, %v540_v7  ;;  %v543_v8 = vmul.f32 %v540_v7, %v508_v61 }
 0x15b   : > { %544 = vst.msk [vmem:[#allocation5] sm:$0xff] %vm402_vm0, %v543_v8 }
 0x160   : > { %v557_v9 = vld [vmem:[#allocation4] sm:$0xff] }
 0x161   : > { %v564_v11 = vrot.slane %v557_v9, 1  ;;  %v565_v12 = vrot.slane %v557_v9, 2  ;;  %v566_v13 = vrot.slane %v557_v9, 3  ;;  %v567_v15 = vrot.slane %v557_v9, 4 }
 0x162   : > { %v571_v17 = vperm.slane %v557_v9, 0  ;;  %v568_v20 = vrot.slane %v557_v9, 5  ;;  %v569_v26 = vrot.slane %v557_v9, 6  ;;  %v570_v30 = vrot.slane %v557_v9, 7 }
 0x163   : > { %v572_v18 = vperm.slane %v564_v11, 0  ;;  %v573_v19 = vperm.slane %v565_v12, 0  ;;  %v574_v21 = vperm.slane %v566_v13, 0  ;;  %v575_v27 = vperm.slane %v567_v15, 0 }
 0x164   : > { %v587_v22 = vmul.f32 %v571_v17, %v561_v10  ;;  %v588_v23 = vmul.f32 %v571_v17, %v562_v14  ;;  %v576_v31 = vperm.slane %v568_v20, 0  ;;  %v577_v38 = vperm.slane %v569_v26, 0 }
 0x165   : > { %v589_v24 = vmul.f32 %v572_v18, %v561_v10  ;;  %v590_v25 = vmul.f32 %v572_v18, %v562_v14  ;;  %v591_v28 = vmul.f32 %v573_v19, %v561_v10  ;;  %v592_v29 = vmul.f32 %v573_v19, %v562_v14 }
 0x166   : > { %v593_v32 = vmul.f32 %v574_v21, %v561_v10  ;;  %v603_v33 = vmul.f32 1.442695, %v587_v22  ;;  %v594_v34 = vmul.f32 %v574_v21, %v562_v14  ;;  %v605_v35 = vmul.f32 1.442695, %v588_v23 }
 0x167   : > { %v607_v36 = vmul.f32 1.442695, %v589_v24  ;;  %v609_v37 = vmul.f32 1.442695, %v590_v25  ;;  %v595_v39 = vmul.f32 %v575_v27, %v561_v10  ;;  %v611_v40 = vmul.f32 1.442695, %v591_v28 }
 0x168   : > { %1450 = vpow2.f32 %v603_v33  ;;  %v596_v41 = vmul.f32 %v575_v27, %v562_v14  ;;  %v613_v42 = vmul.f32 1.442695, %v592_v29  ;;  %v578_v43 = vperm.slane %v570_v30, 0  ;;  %v1935_v33 = vld [vmem:[#allocation5] sm:$0xff] }
 0x169   : > { %1452 = vpow2.f32 %v605_v35  ;;  %v597_v44 = vmul.f32 %v576_v31, %v561_v10  ;;  %v615_v45 = vmul.f32 1.442695, %v593_v32  ;;  %v598_v46 = vmul.f32 %v576_v31, %v562_v14 }
 0x16a   : > { %1454 = vpow2.f32 %v607_v36  ;;  %v617_v47 = vmul.f32 1.442695, %v594_v34  ;;  %v599_v48 = vmul.f32 %v577_v38, %v561_v10  ;;  %v619_v49 = vmul.f32 1.442695, %v595_v39 }
 0x16b   : > { %1456 = vpow2.f32 %v609_v37  ;;  %v600_v50 = vmul.f32 %v577_v38, %v562_v14  ;;  %v621_v51 = vmul.f32 1.442695, %v596_v41  ;;  %v601_v53 = vmul.f32 %v578_v43, %v561_v10 }
 0x16c   : > { %1458 = vpow2.f32 %v611_v40  ;;  %v623_v54 = vmul.f32 1.442695, %v597_v44  ;;  %v602_v56 = vmul.f32 %v578_v43, %v562_v14  ;;  %v625_v57 = vmul.f32 1.442695, %v598_v46 }
 0x16d   : > { %1460 = vpow2.f32 %v613_v42  ;;  %v627_v59 = vmul.f32 1.442695, %v599_v48  ;;  %v629_v61 = vmul.f32 1.442695, %v600_v50  ;;  %v631_v0 = vmul.f32 1.442695, %v601_v53 }
 0x16e   : > { %v1451_v52 = vpop.eup %1450  ;;  %1462 = vpow2.f32 %v615_v45  ;;  %v633_v2 = vmul.f32 1.442695, %v602_v56  ;;  %v652_v13 = vlaneseq  ;;  %v756_v34 = vrot.slane %v1935_v33, 1  ;;  %v555_v50 = vld [vmem:[#allocation3] sm:$0xff] }
 0x16f   : > { %v1453_v55 = vpop.eup %1452  ;;  %1464 = vpow2.f32 %v617_v47  ;;  %635 = vst.msk [vmem:[#allocation9] sm:$0xff] %vm402_vm0, %v1451_v52  ;;  %v757_v42 = vrot.slane %v1935_v33, 2  ;;  %v763_v44 = vperm.slane %v1935_v33, 0 }
 0x170   : > { %v1455_v58 = vpop.eup %1454  ;;  %1466 = vpow2.f32 %v619_v49  ;;  %636 = vst.msk [vmem:[#allocation9 + $0x8] sm:$0xff] %vm402_vm0, %v1453_v55  ;;  %v1907_v14 = vshrl.u32 %v652_v13, 7  ;;  %v764_v35 = vperm.slane %v756_v34, 0  ;;  %v758_v49 = vrot.slane %v1935_v33, 3 }
 0x171   : > { %v1457_v60 = vpop.eup %1456  ;;  %1468 = vpow2.f32 %v621_v51  ;;  %637 = vst.msk [vmem:[#allocation9 + $0x10] sm:$0xff] %vm402_vm0, %v1455_v58  ;;  %v765_v43 = vperm.slane %v757_v42, 0 }
 0x172   : > { %v1459_v62 = vpop.eup %1458  ;;  %1470 = vpow2.f32 %v623_v54  ;;  %638 = vst.msk [vmem:[#allocation9 + $0x18] sm:$0xff] %vm402_vm0, %v1457_v60  ;;  %1430 = vset.pattern.permute.xlu0 %v1907_v14  ;;  %1428 = vset.pattern.permute.xlu2 %v1907_v14  ;;  %v1913_v22 = vadd.s32 8, %v1907_v14  ;;  %v1951_v52 = vperm.slane %v758_v49, 0 }
 0x173   : > { %v1461_v1 = vpop.eup %1460  ;;  %1472 = vpow2.f32 %v625_v57  ;;  %639 = vst.msk [vmem:[#allocation9 + $0x20] sm:$0xff] %vm402_vm0, %v1459_v62  ;;  %1426 = vset.pattern.permute.xlu1 %v1907_v14  ;;  %v759_v57 = vrot.slane %v1935_v33, 4 }
 0x174   : > { %v1463_v3 = vpop.eup %1462  ;;  %1474 = vpow2.f32 %v627_v59  ;;  %640 = vst.msk [vmem:[#allocation9 + $0x28] sm:$0xff] %vm402_vm0, %v1461_v1 }
 0x175   : > { %v1465_v4 = vpop.eup %1464  ;;  %1476 = vpow2.f32 %v629_v61  ;;  %641 = vst.msk [vmem:[#allocation9 + $0x30] sm:$0xff] %vm402_vm0, %v1463_v3 }
 0x176   : > { %v1467_v5 = vpop.eup %1466  ;;  %1478 = vpow2.f32 %v631_v0  ;;  %642 = vst.msk [vmem:[#allocation9 + $0x38] sm:$0xff] %vm402_vm0, %v1465_v4  ;;  %v811_v51 = vld [vmem:[#allocation9] sm:$0xff]  ;;  %v767_v0 = vperm.slane %v759_v57, 0 }
 0x177   : > { %v1469_v6 = vpop.eup %1468  ;;  %1480 = vpow2.f32 %v633_v2  ;;  %643 = vst.msk [vmem:[#allocation9 + $0x40] sm:$0xff] %vm402_vm0, %v1467_v5  ;;  %v813_v55 = vmul.f32 %v811_v51, %v555_v50  ;;  %v761_v50 = vrot.slane %v1935_v33, 6 }
 0x178   : > { %v1471_v7 = vpop.eup %1470  ;;  %644 = vst.msk [vmem:[#allocation9 + $0x48] sm:$0xff] %vm402_vm0, %v1469_v6  ;;  %v822_v60 = vld [vmem:[#allocation9 + $0x10] sm:$0xff] }
 0x179   : > { %v1473_v8 = vpop.eup %1472  ;;  %645 = vst.msk [vmem:[#allocation9 + $0x50] sm:$0xff] %vm402_vm0, %v1471_v7 }
 0x17a   : > { %v1475_v9 = vpop.eup %1474  ;;  %646 = vst.msk [vmem:[#allocation9 + $0x58] sm:$0xff] %vm402_vm0, %v1473_v8  ;;  %v835_v4 = vld [vmem:[#allocation9 + $0x20] sm:$0xff] }
 0x17b   : > { %v1477_v10 = vpop.eup %1476  ;;  %647 = vst.msk [vmem:[#allocation9 + $0x60] sm:$0xff] %vm402_vm0, %v1475_v9 }
 0x17c   : > { %v1479_v11 = vpop.eup %1478  ;;  %648 = vst.msk [vmem:[#allocation9 + $0x68] sm:$0xff] %vm402_vm0, %v1477_v10 }
 0x17d   : > { %v1481_v12 = vpop.eup %1480  ;;  %649 = vst.msk [vmem:[#allocation9 + $0x70] sm:$0xff] %vm402_vm0, %v1479_v11 }
 0x17e   : > { %650 = vst.msk [vmem:[#allocation9 + $0x78] sm:$0xff] %vm402_vm0, %v1481_v12  ;;  %v848_v12 = vld [vmem:[#allocation9 + $0x30] sm:$0xff] }
 0x1c1   : > { %v547_v15 = vpop.permute.xlu0 %546 }
 0x1c2   : > { %550 = vst.msk [vmem:[#allocation6] sm:$0xff] %vm549_vm6, %v547_v15 }
 0x1c9   : > { %v552_v17 = vpop.permute.xlu0 %551  ;;  %v559_v18 = vld [vmem:[#allocation6] sm:$0xff] }
 0x1ca   : > { %554 = vst.msk [vmem:[#allocation7] sm:$0xff] %vm549_vm6, %v552_v17  ;;  %v677_v19 = vperm.slane %v559_v18, 2  ;;  %v664_v20 = vperm.slane %v559_v18, 1  ;;  %v651_v21 = vperm.slane %v559_v18, 0  ;;  %v703_v23 = vperm.slane %v559_v18, 4  ;;  %v556_v17 = vld [vmem:[#allocation3 + $0x8] sm:$0xff] }
 0x1cb   : > { %v742_v24 = vperm.slane %v559_v18, 7  ;;  %v690_v25 = vperm.slane %v559_v18, 3  ;;  %v716_v28 = vperm.slane %v559_v18, 5  ;;  %v729_v29 = vperm.slane %v559_v18, 6  ;;  %v812_v18 = vld [vmem:[#allocation9 + $0x8] sm:$0xff] }
 0x1cc   : > { %682 = vperm.xlu0 %1430, %v677_v19   ;;  %669 = vperm.xlu2 %1428, %v664_v20  }
 0x1cd   : > { %656 = vperm.xlu1 %1426, %v651_v21  }
 0x1d1   : > { %v1922_v26 = vld [vmem:[#allocation7] sm:$0xff] }
 0x1d2   : > { %v925_v27 = vperm.slane %v1922_v26, 1  ;;  %v964_v30 = vperm.slane %v1922_v26, 4  ;;  %v990_v31 = vperm.slane %v1922_v26, 6  ;;  %v912_v32 = vperm.slane %v1922_v26, 0 }
 0x1d3   : > { %v938_v38 = vperm.slane %v1922_v26, 2  ;;  %v951_v39 = vperm.slane %v1922_v26, 3  ;;  %v977_v59 = vperm.slane %v1922_v26, 5 }
 0x1d4   : > { %1432 = vset.pattern.permute.xlu0 %v1913_v22  ;;  %1429 = vset.pattern.permute.xlu2 %v1913_v22 }
 0x1d5   : > { %1427 = vset.pattern.permute.xlu1 %v1913_v22 }
 0x1dc   : > { %714 = vperm.xlu0 %1432, %v703_v23   ;;  %675 = vperm.xlu2 %1429, %v664_v20   ;;  %v1160_v20 = vmul.f32 0.125, %v1871_v16 }
 0x1dd   : > { %662 = vperm.xlu1 %1427, %v651_v21  }
 0x1de   : > { %v1161_v34 = vmul.f32 %v1160_v20, %v1871_v16 }
 0x1e4   : > { %1435 = vset.pattern.permute.xlu0 %v1907_v14  ;;  %1431 = vset.pattern.permute.xlu2 %v1907_v14 }
 0x1e5   : > { %688 = vperm.xlu1 %1427, %v677_v19  }
 0x1ec   : > { %747 = vperm.xlu0 %1435, %v742_v24   ;;  %695 = vperm.xlu2 %1431, %v690_v25  }
 0x1ed   : > { %701 = vperm.xlu1 %1427, %v690_v25   ;;  %v814_v25 = vmul.f32 %v812_v18, %v556_v17  ;;  %v887_v18 = vld [vmem:[#allocation9 + $0x60] sm:$0xff] }
 0x1f4   : > { %1438 = vset.pattern.permute.xlu0 %v1913_v22  ;;  %708 = vperm.xlu2 %1431, %v703_v23   ;;  %v861_v23 = vld [vmem:[#allocation9 + $0x40] sm:$0xff] }
 0x1f5   : > { %1433 = vset.pattern.permute.xlu1 %v1907_v14 }
 0x1fc   : > { %1434 = vset.pattern.permute.xlu2 %v1913_v22  ;;  %936 = vperm.xlu0 %1438, %v925_v27  }
 0x1fd   : > { %721 = vperm.xlu1 %1433, %v716_v28  }
 0x204   : > { %727 = vperm.xlu2 %1434, %v716_v28   ;;  %1441 = vset.pattern.permute.xlu0 %v1907_v14 }
 0x205   : > { %734 = vperm.xlu1 %1433, %v729_v29  }
 0x20c   : > { %740 = vperm.xlu2 %1434, %v729_v29   ;;  %969 = vperm.xlu0 %1441, %v964_v30  }
 0x20d   : > { %1436 = vset.pattern.permute.xlu1 %v1913_v22 }
 0x214   : > { %1437 = vset.pattern.permute.xlu2 %v1907_v14  ;;  %1444 = vset.pattern.permute.xlu0 %v1913_v22 }
 0x215   : > { %753 = vperm.xlu1 %1436, %v742_v24  }
 0x21c   : > { %1001 = vperm.xlu0 %1444, %v990_v31   ;;  %917 = vperm.xlu2 %1437, %v912_v32  }
 0x21d   : > { %923 = vperm.xlu1 %1436, %v912_v32  }
 0x224   : > { %930 = vperm.xlu2 %1437, %v925_v27  }
 0x225   : > { %1439 = vset.pattern.permute.xlu1 %v1907_v14 }
 0x226   : > { %v670_v36 = vpop.permute.xlu2 %669 }
 0x227   : > { %v781_v37 = vmul.f32 %v764_v35, %v670_v36  ;;  %v1003_v36 = vperm.slane %v1922_v26, 7 }
 0x229   : > { %797 = vst.msk [vmem:[#allocation10 + $0x10] sm:$0xff] %vm402_vm0, %v781_v37 }
 0x22c   : > { %1440 = vset.pattern.permute.xlu2 %v1913_v22 }
 0x22d   : > { %943 = vperm.xlu1 %1439, %v938_v38  }
 0x230   : > { %v827_v62 = vld [vmem:[#allocation10 + $0x10] sm:$0xff] }
 0x234   : > { %949 = vperm.xlu2 %1440, %v938_v38   ;;  %v1162_v38 = vmul.f32 0.5, %v1871_v16 }
 0x235   : > { %956 = vperm.xlu1 %1439, %v951_v39  }
 0x236   : > { %v676_v40 = vpop.permute.xlu2 %675 }
 0x237   : > { %v782_v41 = vmul.f32 %v764_v35, %v676_v40  ;;  %v823_v35 = vld [vmem:[#allocation9 + $0x18] sm:$0xff] }
 0x239   : > { %798 = vst.msk [vmem:[#allocation10 + $0x18] sm:$0xff] %vm402_vm0, %v782_v41 }
 0x23c   : > { %962 = vperm.xlu2 %1440, %v951_v39  }
 0x23d   : > { %1442 = vset.pattern.permute.xlu1 %v1913_v22 }
 0x23e   : > { %v683_v45 = vpop.permute.xlu0 %682 }
 0x23f   : > { %v657_v46 = vpop.permute.xlu1 %656  ;;  %v783_v47 = vmul.f32 %v765_v43, %v683_v45  ;;  %v836_v45 = vld [vmem:[#allocation9 + $0x28] sm:$0xff] }
 0x240   : > { %v779_v48 = vmul.f32 %v763_v44, %v657_v46  ;;  %v828_v39 = vld [vmem:[#allocation10 + $0x18] sm:$0xff] }
 0x241   : > { %799 = vst.msk [vmem:[#allocation10 + $0x20] sm:$0xff] %vm402_vm0, %v783_v47 }
 0x242   : > { %795 = vst.msk [vmem:[#allocation10] sm:$0xff] %vm402_vm0, %v779_v48  ;;  %v1163_v48 = vadd.f32 %v1162_v38, %v1161_v34 }
 0x244   : > { %1443 = vset.pattern.permute.xlu2 %v1907_v14 }
 0x245   : > { %975 = vperm.xlu1 %1442, %v964_v30   ;;  %v760_v30 = vrot.slane %v1935_v33, 5 }
 0x246   : > { %v696_v53 = vpop.permute.xlu2 %695 }
 0x247   : > { %v785_v54 = vmul.f32 %v1951_v52, %v696_v53  ;;  %v768_v40 = vperm.slane %v760_v30, 0  ;;  %v1164_v53 = vadd.f32 0.125, %v1163_v48 }
 0x248   : > { %v840_v10 = vld [vmem:[#allocation10 + $0x20] sm:$0xff] }
 0x249   : > { %v815_v56 = vld [vmem:[#allocation10] sm:$0xff]  ;;  %801 = vst.msk [vmem:[#allocation10 + $0x30] sm:$0xff] %vm402_vm0, %v785_v54  ;;  %v769_v54 = vperm.slane %v761_v50, 0 }
 0x24a   : > { %v817_v58 = vadd.f32 %v815_v56, %v813_v55  ;;  %v849_v56 = vld [vmem:[#allocation9 + $0x38] sm:$0xff] }
 0x24c   : > { %v824_v61 = vmul.f32 %v822_v60, %v817_v58  ;;  %819 = vst.msk [vmem:[#allocation11] sm:$0xff] %vm402_vm0, %v817_v58  ;;  %982 = vperm.xlu2 %1443, %v977_v59  }
 0x24d   : > { %988 = vperm.xlu1 %1442, %v977_v59   ;;  %v862_v59 = vld [vmem:[#allocation9 + $0x48] sm:$0xff] }
 0x24e   : > { %v829_v1 = vadd.f32 %v827_v62, %v824_v61  ;;  %v709_v2 = vpop.permute.xlu2 %708  ;;  %v715_v3 = vpop.permute.xlu0 %714 }
 0x24f   : > { %v787_v5 = vmul.f32 %v767_v0, %v709_v2  ;;  %v663_v6 = vpop.permute.xlu1 %662  ;;  %v788_v7 = vmul.f32 %v767_v0, %v715_v3 }
 0x250   : > { %v837_v8 = vmul.f32 %v835_v4, %v829_v1  ;;  %832 = vst.msk [vmem:[#allocation11 + $0x10] sm:$0xff] %vm402_vm0, %v829_v1  ;;  %v780_v9 = vmul.f32 %v763_v44, %v663_v6  ;;  %v853_v15 = vld [vmem:[#allocation10 + $0x30] sm:$0xff]  ;;  %v875_v1 = vld [vmem:[#allocation9 + $0x58] sm:$0xff]  ;;  %v888_v6 = vld [vmem:[#allocation9 + $0x68] sm:$0xff] }
 0x251   : > { %803 = vst.msk [vmem:[#allocation10 + $0x40] sm:$0xff] %vm402_vm0, %v787_v5 }
 0x252   : > { %v842_v11 = vadd.f32 %v840_v10, %v837_v8  ;;  %796 = vst.msk [vmem:[#allocation10 + $0x8] sm:$0xff] %vm402_vm0, %v780_v9 }
 0x253   : > { %804 = vst.msk [vmem:[#allocation10 + $0x48] sm:$0xff] %vm402_vm0, %v788_v7 }
 0x254   : > { %845 = vst.msk [vmem:[#allocation11 + $0x20] sm:$0xff] %vm402_vm0, %v842_v11  ;;  %v850_v13 = vmul.f32 %v848_v12, %v842_v11  ;;  %995 = vperm.xlu2 %1443, %v990_v31   ;;  %v762_v31 = vrot.slane %v1935_v33, 7  ;;  %v874_v11 = vld [vmem:[#allocation9 + $0x50] sm:$0xff] }
 0x255   : > { %1445 = vset.pattern.permute.xlu1 %v1907_v14 }
 0x256   : > { %v855_v19 = vadd.f32 %v853_v15, %v850_v13  ;;  %v1978_v41 = vperm.slane %v762_v31, 0  ;;  %v901_v31 = vld [vmem:[#allocation9 + $0x78] sm:$0xff] }
 0x257   : > { %v689_v21 = vpop.permute.xlu1 %688 }
 0x258   : > { %858 = vst.msk [vmem:[#allocation11 + $0x30] sm:$0xff] %vm402_vm0, %v855_v19  ;;  %v866_v24 = vld [vmem:[#allocation10 + $0x40] sm:$0xff]  ;;  %v784_v27 = vmul.f32 %v765_v43, %v689_v21  ;;  %v863_v28 = vmul.f32 %v861_v23, %v855_v19  ;;  %v900_v23 = vld [vmem:[#allocation9 + $0x70] sm:$0xff] }
 0x259   : > { %v816_v29 = vld [vmem:[#allocation10 + $0x8] sm:$0xff] }
 0x25a   : > { %v818_v32 = vadd.f32 %v816_v29, %v814_v25  ;;  %800 = vst.msk [vmem:[#allocation10 + $0x28] sm:$0xff] %vm402_vm0, %v784_v27  ;;  %v1971_v14 = vadd.f32 %v866_v24, %v863_v28  ;;  %v867_v61 = vld [vmem:[#allocation10 + $0x48] sm:$0xff] }
 0x25c   : > { %v825_v37 = vmul.f32 %v823_v35, %v818_v32  ;;  %820 = vst.msk [vmem:[#allocation11 + $0x8] sm:$0xff] %vm402_vm0, %v818_v32  ;;  %1446 = vset.pattern.permute.xlu2 %v1913_v22  ;;  %v876_v13 = vmul.f32 %v874_v11, %v1971_v14 }
 0x25d   : > { %1008 = vperm.xlu1 %1445, %v1003_v36   ;;  %871 = vst.msk [vmem:[#allocation11 + $0x40] sm:$0xff] %vm402_vm0, %v1971_v14 }
 0x25e   : > { %v830_v42 = vadd.f32 %v828_v39, %v825_v37  ;;  %v728_v43 = vpop.permute.xlu2 %727  ;;  %v748_v44 = vpop.permute.xlu0 %747 }
 0x25f   : > { %v790_v26 = vmul.f32 %v768_v40, %v728_v43  ;;  %v702_v46 = vpop.permute.xlu1 %701  ;;  %v793_v47 = vmul.f32 %v1978_v41, %v748_v44 }
 0x260   : > { %v838_v22 = vmul.f32 %v836_v45, %v830_v42  ;;  %833 = vst.msk [vmem:[#allocation11 + $0x18] sm:$0xff] %vm402_vm0, %v830_v42  ;;  %v786_v16 = vmul.f32 %v1951_v52, %v702_v46  ;;  %v1016_v46 = vld [vmem:[#allocation11] sm:$0xff] }
 0x261   : > { %v841_v49 = vld [vmem:[#allocation10 + $0x28] sm:$0xff]  ;;  %806 = vst.msk [vmem:[#allocation10 + $0x58] sm:$0xff] %vm402_vm0, %v790_v26  ;;  %v1020_v26 = vld [vmem:[#allocation11 + $0x20] sm:$0xff] }
 0x262   : > { %v843_v51 = vadd.f32 %v841_v49, %v838_v22  ;;  %802 = vst.msk [vmem:[#allocation10 + $0x38] sm:$0xff] %vm402_vm0, %v786_v16  ;;  %v1022_v22 = vld [vmem:[#allocation11 + $0x30] sm:$0xff] }
 0x263   : > { %809 = vst.msk [vmem:[#allocation10 + $0x70] sm:$0xff] %vm402_vm0, %v793_v47  ;;  %v1017_v43 = vld [vmem:[#allocation11 + $0x8] sm:$0xff]  ;;  %v1018_v47 = vld [vmem:[#allocation11 + $0x10] sm:$0xff] }
 0x264   : > { %846 = vst.msk [vmem:[#allocation11 + $0x28] sm:$0xff] %vm402_vm0, %v843_v51  ;;  %1014 = vperm.xlu2 %1446, %v1003_v36   ;;  %v851_v57 = vmul.f32 %v849_v56, %v843_v51 }
 0x265   : > { %1166 = vrot.lane.b32.xlu1 %v1164_v53, %s1666_s25  ;;  %s1218_s25 = sshll.u32 %s1214_s19, 4  ;;  %s1219_s25 = int_to_ptr.hbm [resolvable:$true] %s1218_s25 }
 0x266   : > { %v741_v55 = vpop.permute.xlu2 %740  ;;  %s1587_s16 = sshra.s32 %s1219_s25, 4  ;;  %s1588_s16 = int_to_ptr.hbm [resolvable:$true] %s1587_s16 }
 0x267   : > { %v792_v52 = vmul.f32 %v769_v54, %v741_v55  ;;  %v1019_v55 = vld [vmem:[#allocation11 + $0x18] sm:$0xff]  ;;  %s1589_s12 = scalar_lea.hbm %s1588_s16, 8  ;;  %p1594_p11 = scmp.lt.s32.totalorder %s1588_s16, %s2101_s9 }
 0x268   : > { %v880_v4 = vld [vmem:[#allocation10 + $0x58] sm:$0xff]  ;;  %p1590_p1 = scmp.ne.s32.totalorder %s1588_s16, %s1589_s12  ;;  %p1595_p12 = scmp.lt.s32.totalorder %s1593_s22, %s1589_s12 }
 0x269   : > { %v854_v58 = vld [vmem:[#allocation10 + $0x38] sm:$0xff]  ;;  %808 = vst.msk [vmem:[#allocation10 + $0x68] sm:$0xff] %vm402_vm0, %v792_v52 }
 0x26a   : > { %v856_v33 = vadd.f32 %v854_v58, %v851_v57  ;;  %v905_v25 = vld [vmem:[#allocation10 + $0x70] sm:$0xff]  ;;  %p1591_p3 = pnand %p1590_p1, %p1794_p2  ;;  %p1596_p13 = por %p1595_p12, %p1594_p11 }
 0x26b   : > { %v1021_v51 = vld [vmem:[#allocation11 + $0x28] sm:$0xff] }
 0x26c   : > { %v864_v60 = vmul.f32 %v862_v59, %v856_v33  ;;  %859 = vst.msk [vmem:[#allocation11 + $0x38] sm:$0xff] %vm402_vm0, %v856_v33  ;;  %v1024_v33 = vld [vmem:[#allocation11 + $0x40] sm:$0xff]  ;;  %p1592_p7 = pneg %p1591_p3 }
 0x26e   : > { %v869_v62 = vadd.f32 %v867_v61, %v864_v60  ;;  %p1597_p0 = pnand %p1596_p13, %p1592_p7 }
 0x26f   : > { %v722_v0 = vpop.permute.xlu1 %721 }
 0x270   : > { %872 = vst.msk [vmem:[#allocation11 + $0x48] sm:$0xff] %vm402_vm0, %v869_v62  ;;  %v789_v2 = vmul.f32 %v768_v40, %v722_v0  ;;  %v877_v3 = vmul.f32 %v875_v1, %v869_v62  ;;  %v893_v8 = vld [vmem:[#allocation10 + $0x68] sm:$0xff]  ;;  %v937_v40 = vpop.permute.xlu0 %936 }
 0x271   : > { %v1035_v58 = vmul.f32 %v1019_v55, %v937_v40 }
 0x272   : > { %805 = vst.msk [vmem:[#allocation10 + $0x50] sm:$0xff] %vm402_vm0, %v789_v2  ;;  %v882_v5 = vadd.f32 %v880_v4, %v877_v3 }
 0x273   : > { %v1023_v52 = vld [vmem:[#allocation11 + $0x38] sm:$0xff] }
 0x274   : > { %v890_v7 = vmul.f32 %v888_v6, %v882_v5  ;;  %885 = vst.msk [vmem:[#allocation11 + $0x58] sm:$0xff] %vm402_vm0, %v882_v5 }
 0x276   : > { %v895_v9 = vadd.f32 %v893_v8, %v890_v7  ;;  %v918_v30 = vpop.permute.xlu2 %917  ;;  %v1058_v8 = vsel %vm402_vm0, %v1035_v58, 0.0  ;;  %v1175_v58 = vld [vmem:[%s2100_s8 + $0x28] sm:$0xff] }
 0x277   : > { %v735_v10 = vpop.permute.xlu1 %734  ;;  %v1032_v49 = vmul.f32 %v1016_v46, %v918_v30 }
 0x278   : > { %v791_v12 = vmul.f32 %v769_v54, %v735_v10  ;;  %898 = vst.msk [vmem:[#allocation11 + $0x68] sm:$0xff] %vm402_vm0, %v895_v9  ;;  %v903_v32 = vmul.f32 %v901_v31, %v895_v9  ;;  %v1025_v54 = vld [vmem:[#allocation11 + $0x48] sm:$0xff] }
 0x279   : > { %v879_v15 = vld [vmem:[#allocation10 + $0x50] sm:$0xff]  ;;  %v1048_v0 = vsel %vm402_vm0, %v1032_v49, 0.0 }
 0x27a   : > { %807 = vst.msk [vmem:[#allocation10 + $0x60] sm:$0xff] %vm402_vm0, %v791_v12  ;;  %v881_v17 = vadd.f32 %v879_v15, %v876_v13 }
 0x27c   : > { %884 = vst.msk [vmem:[#allocation11 + $0x50] sm:$0xff] %vm402_vm0, %v881_v17  ;;  %v889_v19 = vmul.f32 %v887_v18, %v881_v17 }
 0x27e   : > { %v931_v35 = vpop.permute.xlu2 %930  ;;  %v970_v44 = vpop.permute.xlu0 %969 }
 0x27f   : > { %v1034_v50 = vmul.f32 %v1018_v47, %v931_v35  ;;  %v1040_v61 = vmul.f32 %v1024_v33, %v970_v44 }
 0x281   : > { %v892_v20 = vld [vmem:[#allocation10 + $0x60] sm:$0xff]  ;;  %v1057_v1 = vsel %vm402_vm0, %v1034_v50, 0.0  ;;  %v1084_v17 = vsel %vm402_vm0, %v1040_v61, 0.0  ;;  %v1177_v50 = vld [vmem:[%s2100_s8 + $0x38] sm:$0xff] }
 0x282   : > { %v894_v21 = vadd.f32 %v892_v20, %v889_v19  ;;  %v1059_v15 = vadd.f32 %v1058_v8, %v1057_v1  ;;  %1189 = vmatpush.msra.mxu2 %v1177_v50  ;;  %v1174_v1 = vld [vmem:[%s2100_s8 + $0x20] sm:$0xff]  ;;  %v1173_v8 = vld [vmem:[%s2100_s8 + $0x18] sm:$0xff] }
 0x283   : > { %v1026_v6 = vld [vmem:[#allocation11 + $0x50] sm:$0xff] }
 0x284   : > { %897 = vst.msk [vmem:[#allocation11 + $0x60] sm:$0xff] %vm402_vm0, %v894_v21  ;;  %v902_v24 = vmul.f32 %v900_v23, %v894_v21  ;;  %v1027_v21 = vld [vmem:[#allocation11 + $0x58] sm:$0xff]  ;;  %v1029_v23 = vld [vmem:[#allocation11 + $0x68] sm:$0xff] }
 0x286   : > { %v907_v27 = vadd.f32 %v905_v25, %v902_v24 }
 0x287   : > { %v754_v28 = vpop.permute.xlu1 %753 }
 0x288   : > { %v794_v29 = vmul.f32 %v1978_v41, %v754_v28  ;;  %910 = vst.msk [vmem:[#allocation11 + $0x70] sm:$0xff] %vm402_vm0, %v907_v27 }
 0x289   : > { %1144 = vst.msk [vmem:[#allocation3] sm:$0xff] %vm402_vm0, %v907_v27 }
 0x28a   : > { %810 = vst.msk [vmem:[#allocation10 + $0x78] sm:$0xff] %vm402_vm0, %v794_v29 }
 0x28b   : > { %v1028_v13 = vld [vmem:[#allocation11 + $0x60] sm:$0xff] }
 0x28e   : > { %v950_v37 = vpop.permute.xlu2 %949  ;;  %v1002_v9 = vpop.permute.xlu0 %1001 }
 0x28f   : > { %v924_v36 = vpop.permute.xlu1 %923  ;;  %v1037_v56 = vmul.f32 %v1021_v51, %v950_v37  ;;  %v1045_v28 = vmul.f32 %v1029_v23, %v1002_v9  ;;  %v1176_v51 = vld [vmem:[%s2100_s8 + $0x30] sm:$0xff]  ;;  %v1030_v61 = vld [vmem:[#allocation11 + $0x70] sm:$0xff] }
 0x290   : > { %v1033_v45 = vmul.f32 %v1017_v43, %v924_v36  ;;  %1190 = vmatpush.msra.mxu2 %v1176_v51 }
 0x291   : > { %v906_v14 = vld [vmem:[#allocation10 + $0x78] sm:$0xff]  ;;  %v1067_v5 = vsel %vm402_vm0, %v1037_v56, 0.0 }
 0x292   : > { %v908_v34 = vadd.f32 %v906_v14, %v903_v32  ;;  %v1049_v59 = vsel %vm402_vm0, %v1033_v45, 0.0  ;;  %v1060_v32 = vrot.slane %v1059_v15, 4  ;;  %1191 = vmatpush.msra.mxu2 %v1175_v58 }
 0x293   : > { %v1050_v4 = vadd.f32 %v1049_v59, %v1048_v0 }
 0x294   : > { %911 = vst.msk [vmem:[#allocation11 + $0x78] sm:$0xff] %vm402_vm0, %v908_v34  ;;  %1192 = vmatpush.msra.mxu2 %v1174_v1 }
 0x295   : > { %1145 = vst.msk [vmem:[#allocation3 + $0x8] sm:$0xff] %vm402_vm0, %v908_v34  ;;  %v1051_v27 = vrot.slane %v1050_v4, 4 }
 0x296   : > { %v963_v39 = vpop.permute.xlu2 %962  ;;  %1193 = vmatpush.msra.mxu2 %v1173_v8 }
 0x297   : > { %v1039_v60 = vmul.f32 %v1023_v52, %v963_v39  ;;  %v1052_v37 = vadd.f32 %v1051_v27, %v1050_v4 }
 0x299   : > { %v1076_v10 = vsel %vm402_vm0, %v1039_v60, 0.0  ;;  %v1053_v45 = vrot.slane %v1052_v37, 2 }
 0x29b   : > { %v1031_v55 = vld [vmem:[#allocation11 + $0x78] sm:$0xff] }
 0x29f   : > { %v944_v38 = vpop.permute.xlu1 %943 }
 0x2a0   : > { %v1036_v48 = vmul.f32 %v1020_v26, %v944_v38  ;;  %v1103_v38 = vsel %vm402_vm0, %v1045_v28, 0.0  ;;  %v1170_v28 = vld [vmem:[%s2100_s8] sm:$0xff] }
 0x2a2   : > { %v1066_v62 = vsel %vm402_vm0, %v1036_v48, 0.0 }
 0x2a3   : > { %v1068_v11 = vadd.f32 %v1067_v5, %v1066_v62 }
 0x2a5   : > { %v1069_v29 = vrot.slane %v1068_v11, 4 }
 0x2a6   : > { %v983_v42 = vpop.permute.xlu2 %982 }
 0x2a7   : > { %v957_v41 = vpop.permute.xlu1 %956  ;;  %v1042_v12 = vmul.f32 %v1026_v6, %v983_v42  ;;  %v1070_v40 = vadd.f32 %v1069_v29, %v1068_v11  ;;  %v1061_v42 = vadd.f32 %v1060_v32, %v1059_v15 }
 0x2a8   : > { %v1038_v53 = vmul.f32 %v1022_v22, %v957_v41 }
 0x2a9   : > { %v1093_v30 = vsel %vm402_vm0, %v1042_v12, 0.0  ;;  %v1071_v46 = vrot.slane %v1070_v40, 2  ;;  %v1062_v48 = vrot.slane %v1061_v42, 2 }
 0x2aa   : > { %v1075_v2 = vsel %vm402_vm0, %v1038_v53, 0.0  ;;  %v1054_v53 = vadd.f32 %v1053_v45, %v1052_v37 }
 0x2ab   : > { %v1077_v18 = vadd.f32 %v1076_v10, %v1075_v2  ;;  %v1072_v56 = vadd.f32 %v1071_v46, %v1070_v40  ;;  %v1063_v33 = vadd.f32 %v1062_v48, %v1061_v42 }
 0x2ac   : > { %v1055_v2 = vrot.slane %v1054_v53, 1 }
 0x2ad   : > { %v1078_v14 = vrot.slane %v1077_v18, 4  ;;  %v1073_v4 = vrot.slane %v1072_v56, 1  ;;  %v1064_v9 = vrot.slane %v1063_v33, 1 }
 0x2ae   : > { %v996_v3 = vpop.permute.xlu2 %995  ;;  %v1056_v15 = vadd.f32 %v1055_v2, %v1054_v53 }
 0x2af   : > { %v1044_v19 = vmul.f32 %v1028_v13, %v996_v3  ;;  %v1079_v43 = vadd.f32 %v1078_v14, %v1077_v18  ;;  %v1172_v13 = vld [vmem:[%s2100_s8 + $0x10] sm:$0xff]  ;;  %v1065_v23 = vadd.f32 %v1064_v9, %v1063_v33 }
 0x2b0   : > { %1194 = vmatpush.msra.mxu2 %v1172_v13 }
 0x2b1   : > { %v1102_v34 = vsel %vm402_vm0, %v1044_v19, 0.0  ;;  %v1080_v22 = vrot.slane %v1079_v43, 2  ;;  %v1074_v19 = vadd.f32 %v1073_v4, %v1072_v56  ;;  %v1129_v29 = vsel %vm1128_vm7, %v1065_v23, %v1056_v15 }
 0x2b2   : > { %v1104_v41 = vadd.f32 %v1103_v38, %v1102_v34 }
 0x2b3   : > { %v1081_v59 = vadd.f32 %v1080_v22, %v1079_v43  ;;  %v1131_v32 = vsel %vm1130_vm8, %v1074_v19, %v1129_v29 }
 0x2b4   : > { %v1105_v47 = vrot.slane %v1104_v41, 4 }
 0x2b5   : > { %v1082_v10 = vrot.slane %v1081_v59, 1 }
 0x2b6   : > { %v1106_v52 = vadd.f32 %v1105_v47, %v1104_v41  ;;  %v1482_v47 = vld [vmem:[%s1820_s6] sm:$0xff] }
 0x2b7   : > { %v976_v16 = vpop.permute.xlu1 %975 }
 0x2b8   : > { %v1041_v57 = vmul.f32 %v1025_v54, %v976_v16  ;;  %v1107_v5 = vrot.slane %v1106_v52, 2 }
 0x2ba   : > { %v1085_v7 = vsel %vm402_vm0, %v1041_v57, 0.0 }
 0x2bb   : > { %v1086_v24 = vadd.f32 %v1085_v7, %v1084_v17 }
 0x2bd   : > { %v1087_v36 = vrot.slane %v1086_v24, 4 }
 0x2be   : > { %v1015_v16 = vpop.permute.xlu2 %1014 }
 0x2bf   : > { %v989_v20 = vpop.permute.xlu1 %988  ;;  %v1088_v44 = vadd.f32 %v1087_v36, %v1086_v24  ;;  %v1047_v57 = vmul.f32 %v1031_v55, %v1015_v16  ;;  %v1083_v24 = vadd.f32 %v1082_v10, %v1081_v59 }
 0x2c0   : > { %v1043_v25 = vmul.f32 %v1027_v21, %v989_v20  ;;  %v1108_v20 = vadd.f32 %v1107_v5, %v1106_v52  ;;  %v1171_v21 = vld [vmem:[%s2100_s8 + $0x8] sm:$0xff] }
 0x2c1   : > { %v1089_v49 = vrot.slane %v1088_v44, 2  ;;  %v1112_v6 = vsel %vm402_vm0, %v1047_v57, 0.0  ;;  %1195 = vmatpush.msra.mxu2 %v1171_v21  ;;  %v1133_v34 = vsel %vm1132_vm9, %v1083_v24, %v1131_v32 }
 0x2c2   : > { %v1094_v31 = vsel %vm402_vm0, %v1043_v25, 0.0  ;;  %v1109_v14 = vrot.slane %v1108_v20, 1 }
 0x2c3   : > { %v1095_v35 = vadd.f32 %v1094_v31, %v1093_v30  ;;  %v1090_v62 = vadd.f32 %v1089_v49, %v1088_v44  ;;  %1196 = vmatpush.msra.mxu2 %v1170_v28 }
 0x2c5   : > { %v1096_v39 = vrot.slane %v1095_v35, 4  ;;  %v1091_v12 = vrot.slane %v1090_v62, 1 }
 0x2c7   : > { %v1097_v26 = vadd.f32 %v1096_v39, %v1095_v35  ;;  %v1092_v27 = vadd.f32 %v1091_v12, %v1090_v62  ;;  %v1110_v39 = vadd.f32 %v1109_v14, %v1108_v20 }
 0x2c9   : > { %v1098_v54 = vrot.slane %v1097_v26, 2  ;;  %v1135_v36 = vsel %vm1134_vm10, %v1092_v27, %v1133_v34 }
 0x2cb   : > { %v1099_v3 = vadd.f32 %v1098_v54, %v1097_v26 }
 0x2cd   : > { %v1100_v17 = vrot.slane %v1099_v3, 1 }
 0x2cf   : > { %v1009_v60 = vpop.permute.xlu1 %1008  ;;  %v1101_v30 = vadd.f32 %v1100_v17, %v1099_v3 }
 0x2d0   : > { %v1046_v0 = vmul.f32 %v1030_v61, %v1009_v60 }
 0x2d1   : > { %v1137_v37 = vsel %vm1136_vm11, %v1101_v30, %v1135_v36 }
 0x2d2   : > { %v1111_v7 = vsel %vm402_vm0, %v1046_v0, 0.0  ;;  %v1139_v41 = vsel %vm1138_vm12, %v1110_v39, %v1137_v37 }
 0x2d3   : > { %v1113_v11 = vadd.f32 %v1112_v6, %v1111_v7 }
 0x2d5   : > { %v1114_v18 = vrot.slane %v1113_v11, 4 }
 0x2d7   : > { %v1115_v25 = vadd.f32 %v1114_v18, %v1113_v11  ;;  %v1167_v45 = vpop.permute.xlu1 %1166 }
 0x2d9   : > { %v1116_v31 = vrot.slane %v1115_v25, 2 }
 0x2db   : > { %v1117_v35 = vadd.f32 %v1116_v31, %v1115_v25 }
 0x2dd   : > { %v1118_v38 = vrot.slane %v1117_v35, 1 }
 0x2df   : > { %v1119_v40 = vadd.f32 %v1118_v38, %v1117_v35 }
 0x2e1   : > { %v1141_v42 = vsel %vm1140_vm13, %v1119_v40, %v1139_v41 }
 0x2e2   : > { %1143 = vst.msk [vmem:[#allocation8] sm:$0xff] %vm402_vm0, %v1141_v42 }
 0x2e9   : > { %v1146_v43 = vld [vmem:[#allocation8] sm:$0xff] }
 0x2ea   : > { %v1159_v44 = vadd.f32 %v1883_v63, %v1146_v43 }
 0x2ec   : > { %v1169_v26 = vmul.f32 %v1167_v45, %v1159_v44 }
 0x2ee   : > { %1333 = vmatmul.msk.f32.vlgmr.msra.gmra.mxu2 %vm402_vm0, %v1169_v26 }
 0x371   : > { %v1198_v46 = vpop.f32.mrf.mxu2 }
 0x372   : > { %v1199_v48 = vadd.f32 %v1482_v47, %v1198_v46 }
 0x374   : > { %1201 = vst.msk [vmem:[%s397_s17] sm:$0xff] %vm411_vm1, %v1199_v48 }
 0x375   : > { %1600 = shalt.err (!%p1597_p0)
}
 0x376   : > { %1348 = dma.vmem_to_hbm [thread:$0]  (%p1794_p2), %s1217_s23, 128, %s1219_s25, %s1203_s28  }
 0x377 PF: > { %s2115_s26 = sld [smem:[#allocation22_spill]]  ;;  %p1362_p4 = pnand %p1323_p8, %p1765_p5 }
 0x379   : > { %p1363_p6 = pneg %p1362_p4 }
 0x37d   : > { %s1230_s30 = sand.u32 1, %s2115_s26  }
 0x37e   : > { %s1231_s18 = scalar_lea.sflag [#allocation14], %s1230_s30 }
 0x37f   : > { %1634 = dma.done.wait (%p1363_p6), %s1231_s18, 128  }
 0x380   : > { %1636 = vsyncadd (%p1363_p6), %s1231_s18, 4294967168  ;;  %s26_s14 = sadd.s32 1, %s1659_s14   ;;  %s2117_s30 = smov %s1643_s10 }
 0x381   : > { %p23_p9 = scmp.ge.s32.totalorder %s26_s14, 4   ;;  %s2118_s10 = smov %s1647_s11 }
 0x382   : > { %s2119_s11 = smov %s1804_s29  ;;  %s2120_s12 = smov %s1655_s13 }
 0x383   : > { %s2121_s13 = smov %s2123_s24  ;;  %25 = sbr.rel (!%p23_p9) target bundleno = 10 (0xa), region = 134 }
 0x388   :  { %1237 = vsyncpa [#allocation13], 1 }
 0x389   :  { %1239 = vsyncpa [#allocation13 + $0x1], 1 }
 0x38a   :  { %1240 = vsyncpa [#allocation16], 1 }
 0x38b   :  { %1241 = vsyncpa [#allocation14], 1 }
 0x38c   :  { %1243 = vsyncpa [#allocation14 + $0x1], 1 }

</bundles_post_ra>
